<compile_context>
chip_gen: v7x
topology: tpu7x:2x2x1
jax: 0.10.0
libtpu: 0.0.40
codegen_flags: <defaults>
</compile_context>

<pallas_src>
import functools

import jax
import jax.numpy as jnp
from jax.experimental import pallas as pl
from jax.experimental.pallas import tpu as pltpu


# -----------------------------------------------------------------------------
# Pallas kernel
# -----------------------------------------------------------------------------
def bilstm_classifier_kernel(
    x_ref,      # (Bt, T*F)     lane-dense, time-flattened input tile
    win_ref,    # (T*F, T*8H)   time-block-diagonal input->gate weights (both dirs)
    ball_ref,   # (1, T*8H)     folded gate biases (b_ih + b_hh, both dirs, all steps)
    whh_ref,    # (2H, 8H)      block-diagonal hidden->gate weights (both dirs)
    w1_ref,     # (2H, HP)      fc1 weight, lane-padded
    b1_ref,     # (1, HP)
    w2_ref,     # (HP, 128)     fc2 weight, lane-tiled (lane-dense final store)
    b2_ref,     # (1, 128)
    y_ref,      # (Bt, 128)     output tile (all lanes identical; wrapper keeps lane 0)
    *,
    negative_slope: float,
):
    Bt = x_ref.shape[0]
    H2x = whh_ref.shape[0]          # 2H  ([h_f | h_b] lane-concatenated state width)
    G2 = whh_ref.shape[1]           # 8H  (both directions' 4 gates, dir-interleaved)
    T = win_ref.shape[1] // G2
    wdt = whh_ref.dtype             # MXU operand dtype (f32 or bf16); accum stays f32

    # ---- Hoisted input projection: all T steps, both directions, ONE matmul. -------
    # Output block s already pairs fwd-gate pre-acts of time s with bwd-gate pre-acts
    # of time T-1-s (packed that way in the wrapper), so each recurrence step below
    # consumes one contiguous 8H-lane slice.
    xg = (
        jnp.dot(x_ref[...], win_ref[...], preferred_element_type=jnp.float32)
        + ball_ref[...]
    )                               # (Bt, T*8H), f32

    whh = whh_ref[...]

    # ---- Fused bidirectional recurrence (T static & small -> full unroll). ---------
    h = jnp.zeros((Bt, H2x), jnp.float32)   # [h_f | h_b]
    c = jnp.zeros((Bt, H2x), jnp.float32)   # [c_f | c_b]
    for s in range(T):
        pre = (
            jnp.dot(h.astype(wdt), whh, preferred_element_type=jnp.float32)
            + xg[:, s * G2:(s + 1) * G2]
        )                                    # (Bt, 8H), layout [i_f i_b f_f f_b g_f g_b o_f o_b]
        sg = jax.nn.sigmoid(pre)             # one EUP pass over all 8 gate blocks
        tg = jnp.tanh(pre)
        i = sg[:, 0 * H2x:1 * H2x]           # [i_f | i_b]
        f = sg[:, 1 * H2x:2 * H2x]           # [f_f | f_b]
        g = tg[:, 2 * H2x:3 * H2x]           # [g_f | g_b]
        o = sg[:, 3 * H2x:4 * H2x]           # [o_f | o_b]
        c = f * c + i * g
        h = o * jnp.tanh(c)                  # stays laid out as [h_f | h_b]

    # ---- Head: h already equals concat(hidden[0], hidden[1]). ----------------------
    rel = jnp.where(h >= 0, h, negative_slope * h)
    d1 = jnp.dot(rel.astype(wdt), w1_ref[...], preferred_element_type=jnp.float32) + b1_ref[...]
    r1 = jnp.where(d1 >= 0, d1, negative_slope * d1)
    d2 = jnp.dot(r1.astype(wdt), w2_ref[...], preferred_element_type=jnp.float32) + b2_ref[...]
    y_ref[...] = jax.nn.sigmoid(d2)          # lane-dense, unmasked store


# -----------------------------------------------------------------------------
# Weight packing (done once per call, plain XLA, outside the kernel)
# -----------------------------------------------------------------------------
def _round_up(n, m):
    return ((n + m - 1) // m) * m


def _interleave_gates(wf, wb):
    """[i|f|g|o] per direction (each 4H wide) -> [i_f i_b f_f f_b g_f g_b o_f o_b]."""
    *lead, g4 = wf.shape
    h = g4 // 4
    wf4 = wf.reshape(*lead, 4, h)
    wb4 = wb.reshape(*lead, 4, h)
    return jnp.stack([wf4, wb4], axis=-2).reshape(*lead, 8 * h)


def _pack_params(params, T, mxu_dtype):
    wih_f, wih_b = params["wih_f"], params["wih_b"]        # (F, 4H)
    whh_f, whh_b = params["whh_f"], params["whh_b"]        # (H, 4H)
    F, G = wih_f.shape
    H = G // 4
    H2 = params["w1"].shape[1]
    G2 = 2 * G                                             # 8H

    # Block-diagonal hidden->gates weight: rows [h_f | h_b], columns dir-interleaved.
    whh_bd = jnp.concatenate(
        [_interleave_gates(whh_f, jnp.zeros_like(whh_f)),
         _interleave_gates(jnp.zeros_like(whh_b), whh_b)],
        axis=0,
    )                                                      # (2H, 8H)

    # Input projection for ALL time steps in one lane-dense matmul:
    #   x_dense (B, T*F) @ W_in (T*F, T*8H) -> xg (B, T*8H)
    # Output time-block s gets fwd gates from input time s and bwd gates from input
    # time T-1-s, so the recurrence reads contiguous slices with no per-step select.
    wf_cols = _interleave_gates(wih_f, jnp.zeros_like(wih_b))   # fwd columns only
    wb_cols = _interleave_gates(jnp.zeros_like(wih_f), wih_b)   # bwd columns only
    eye = jnp.eye(T, dtype=jnp.float32)
    w_in = (
        jnp.einsum("st,fg->sftg", eye, wf_cols)
        + jnp.einsum("st,fg->sftg", eye[::-1], wb_cols)
    ).reshape(T * F, T * G2)
    b_all = jnp.tile(_interleave_gates(params["b_f"], params["b_b"]), (1, T))  # (1, T*8H)

    # Head, padded to lane-dense widths (zero rows/cols are exact no-ops).
    HP = _round_up(max(H2, 1), 128)
    w1 = jnp.zeros((2 * H, HP), jnp.float32).at[:, :H2].set(params["w1"])
    b1 = jnp.zeros((1, HP), jnp.float32).at[:, :H2].set(params["b1"])
    w2 = jnp.zeros((HP, 128), jnp.float32).at[:H2, :].set(jnp.tile(params["w2"], (1, 128)))
    b2 = jnp.tile(params["b2"], (1, 128))

    cast = lambda w: w.astype(mxu_dtype)
    return dict(w_in=cast(w_in), b_all=b_all, whh=cast(whh_bd),
                w1=cast(w1), b1=b1, w2=cast(w2), b2=b2)


def _default_mxu_dtype():
    # bf16 MXU operands pay off on v6e/v7x (native bf16 MXU + bf16 VPU); keep f32
    # operands on v5e/older or unknown backends.
    try:
        kind = jax.devices()[0].device_kind.lower()
    except Exception:
        return jnp.float32
    if ("v6" in kind) or ("v7" in kind) or ("trillium" in kind):
        return jnp.bfloat16
    return jnp.float32


# -----------------------------------------------------------------------------
# Wrapper
# -----------------------------------------------------------------------------
def bilstm_classifier_forward(sequences, params, *, negative_slope=0.3,
                              batch_tile=None, mxu_dtype=None):
    """sequences: (B, T, F) batch-first, like the PyTorch module. Returns (B, 1)."""
    B, T, F = sequences.shape
    H = params["whh_f"].shape[0]
    G2 = 8 * H
    if mxu_dtype is None:
        mxu_dtype = _default_mxu_dtype()

    packed = _pack_params(params, T, mxu_dtype)
    HP = packed["w1"].shape[1]

    # ---- Batch tile selection -------------------------------------------------------
    # Fill MXU rows (cap 256 keeps xg ~2 MiB, inside every chip's default scoped VMEM)
    # and keep >=2 grid steps when the batch allows it so v7x's 2nd TC gets work.
    sub = 16 if jnp.dtype(mxu_dtype).itemsize < 4 else 8     # sublane tile granularity
    bt = batch_tile
    if bt is None:
        bt = min(256, _round_up(B, sub))
        if B > sub:
            bt = min(bt, max(sub, _round_up((B + 1) // 2, sub)))
    bt = max(sub, _round_up(bt, sub))
    B_pad = _round_up(B, bt)

    # Lane-dense x: (B_pad, T*F). Plain XLA reshape/pad in the wrapper.
    x = sequences.astype(jnp.float32).reshape(B, T * F)
    if B_pad != B:
        x = jnp.pad(x, ((0, B_pad - B), (0, 0)))
    x = x.astype(mxu_dtype)

    grid = (B_pad // bt,)

    def const_spec(shape):
        # Weight blocks: same block every grid step -> stay resident in VMEM.
        return pl.BlockSpec(shape, lambda i: (0,) * len(shape))

    y_wide = pl.pallas_call(
        functools.partial(bilstm_classifier_kernel, negative_slope=negative_slope),
        out_shape=jax.ShapeDtypeStruct((B_pad, 128), jnp.float32),
        grid_spec=pltpu.PrefetchScalarGridSpec(
            num_scalar_prefetch=0,
            grid=grid,
            in_specs=[
                pl.BlockSpec((bt, T * F), lambda i: (i, 0)),   # x (batch-tiled, lane-dense)
                const_spec((T * F, T * G2)),                   # W_in (time-block-diagonal)
                const_spec((1, T * G2)),                       # folded gate biases
                const_spec((2 * H, G2)),                       # whh (block-diagonal)
                const_spec((2 * H, HP)),                       # w1 (lane-padded)
                const_spec((1, HP)),                           # b1
                const_spec((HP, 128)),                         # w2 (lane-tiled)
                const_spec((1, 128)),                          # b2
            ],
            out_specs=pl.BlockSpec((bt, 128), lambda i: (i, 0)),
        ),
        compiler_params=pltpu.CompilerParams(dimension_semantics=("parallel",)),
    )(x, packed["w_in"], packed["b_all"], packed["whh"],
      packed["w1"], packed["b1"], packed["w2"], packed["b2"])

    return y_wide[:B, :1]


# -----------------------------------------------------------------------------
# Deterministic parameter construction (shapes follow nn.LSTM / nn.Linear)
# -----------------------------------------------------------------------------
def init_params(key, n_features, n_hidden):
    H, F = n_hidden, n_features
    H2 = n_hidden // 2
    ks = jax.random.split(key, 12)
    s = 1.0 / jnp.sqrt(H)

    def u(k, shape):
        return jax.random.uniform(k, shape, jnp.float32, -s, s)

    # PyTorch stores weight_ih as (4H, F) and weight_hh as (4H, H); we store transposed.
    return {
        "wih_f": u(ks[0], (F, 4 * H)),
        "whh_f": u(ks[1], (H, 4 * H)),
        "b_f":   u(ks[2], (1, 4 * H)) + u(ks[3], (1, 4 * H)),   # b_ih + b_hh
        "wih_b": u(ks[4], (F, 4 * H)),
        "whh_b": u(ks[5], (H, 4 * H)),
        "b_b":   u(ks[6], (1, 4 * H)) + u(ks[7], (1, 4 * H)),
        "w1":    u(ks[8], (2 * H, H2)),
        "b1":    u(ks[9], (1, H2)),
        "w2":    u(ks[10], (H2, 1)),
        "b2":    u(ks[11], (1, 1)),
    }


# -----------------------------------------------------------------------------
# Pure-JAX reference (mirrors PyTorch semantics) for verification
# -----------------------------------------------------------------------------
def reference_forward(sequences, params, negative_slope=0.3):
    sequences = sequences.astype(jnp.float32)
    B, T, F = sequences.shape
    H = params["whh_f"].shape[0]

    def mm(a, b):
        return jnp.dot(a, b, precision=jax.lax.Precision.HIGHEST)

    def lstm_dir(wih, whh, b, reverse):
        h = jnp.zeros((B, H), jnp.float32)
        c = jnp.zeros((B, H), jnp.float32)
        order = range(T - 1, -1, -1) if reverse else range(T)
        for t in order:
            gates = mm(sequences[:, t, :], wih) + mm(h, whh) + b
            i = jax.nn.sigmoid(gates[:, 0 * H:1 * H])
            f = jax.nn.sigmoid(gates[:, 1 * H:2 * H])
            g = jnp.tanh(gates[:, 2 * H:3 * H])
            o = jax.nn.sigmoid(gates[:, 3 * H:4 * H])
            c = f * c + i * g
            h = o * jnp.tanh(c)
        return h

    h_fwd = lstm_dir(params["wih_f"], params["whh_f"], params["b_f"], False)
    h_bwd = lstm_dir(params["wih_b"], params["whh_b"], params["b_b"], True)
    cat = jnp.concatenate([h_fwd, h_bwd], axis=1)
    leaky = lambda v: jnp.where(v >= 0, v, negative_slope * v)
    d1 = mm(leaky(cat), params["w1"]) + params["b1"]
    d2 = mm(leaky(d1), params["w2"]) + params["b2"]
    return jax.nn.sigmoid(d2)


if __name__ == "__main__":
    # Small shapes consistent with the module: batch=8, seq_len=8, n_features=16, n_hidden=32
    B, T, F, H = 8, 8, 16, 32
    key = jax.random.PRNGKey(0)
    k_x, k_p, k_x2 = jax.random.split(key, 3)

    sequences = jax.random.normal(k_x, (B, T, F), jnp.float32)
    params = init_params(k_p, n_features=F, n_hidden=H)
    y_ref = reference_forward(sequences, params, negative_slope=0.3)

    # f32 MXU-operand path (default on v5e / unknown chips).
    y32 = bilstm_classifier_forward(sequences, params, negative_slope=0.3,
                                    mxu_dtype=jnp.float32)
    y32 = jax.block_until_ready(y32)
    assert y32.shape == (B, 1), y32.shape
    assert jnp.allclose(y32, y_ref, atol=2e-3, rtol=2e-3), (y32, y_ref)

    # bf16 MXU-operand path (default perf path on v6e/v7x); f32 accumulation & state.
    y16 = bilstm_classifier_forward(sequences, params, negative_slope=0.3,
                                    mxu_dtype=jnp.bfloat16)
    y16 = jax.block_until_ready(y16)
    assert y16.shape == (B, 1), y16.shape
    assert jnp.allclose(y16, y_ref, atol=3e-2, rtol=3e-2), (y16, y_ref)

    # Larger batch exercises batch padding + a multi-step grid (megacore path on v7x).
    seq2 = jax.random.normal(k_x2, (24, T, F), jnp.float32)
    y2 = jax.block_until_ready(
        bilstm_classifier_forward(seq2, params, negative_slope=0.3, mxu_dtype=jnp.float32))
    y2_ref = reference_forward(seq2, params, negative_slope=0.3)
    assert y2.shape == (24, 1), y2.shape
    assert jnp.allclose(y2, y2_ref, atol=2e-3, rtol=2e-3), (y2, y2_ref)

    print("KERNEL_OK")
</pallas_src>

<mosaic_0001>
module attributes {stable_mosaic.version = 11 : i64} {
  func.func @bilstm_classifier_kernel(%arg0: i32, %arg1: memref<8x128xf32, #tpu.memory_space<vmem>>, %arg2: memref<128x2048xf32, #tpu.memory_space<vmem>>, %arg3: memref<1x2048xf32, #tpu.memory_space<vmem>>, %arg4: memref<64x256xf32, #tpu.memory_space<vmem>>, %arg5: memref<64x128xf32, #tpu.memory_space<vmem>>, %arg6: memref<1x128xf32, #tpu.memory_space<vmem>>, %arg7: memref<128x128xf32, #tpu.memory_space<vmem>>, %arg8: memref<1x128xf32, #tpu.memory_space<vmem>>, %arg9: memref<8x128xf32, #tpu.memory_space<vmem>>) attributes {dimension_semantics = [#tpu.dimension_semantics<parallel>], iteration_bounds = array<i64: 1>, scalar_prefetch = 0 : i64, scratch_operands = 0 : i64, tpu.core_type = #tpu.core_type<tc>, window_params = [{transform_indices = @transform_0, window_bounds = array<i64: 8, 128>}, {pipeline_mode = #tpu.pipeline_mode<synchronous>, transform_indices = @transform_1, window_bounds = array<i64: 128, 2048>}, {pipeline_mode = #tpu.pipeline_mode<synchronous>, transform_indices = @transform_2, window_bounds = array<i64: 1, 2048>}, {pipeline_mode = #tpu.pipeline_mode<synchronous>, transform_indices = @transform_3, window_bounds = array<i64: 64, 256>}, {pipeline_mode = #tpu.pipeline_mode<synchronous>, transform_indices = @transform_4, window_bounds = array<i64: 64, 128>}, {pipeline_mode = #tpu.pipeline_mode<synchronous>, transform_indices = @transform_5, window_bounds = array<i64: 1, 128>}, {pipeline_mode = #tpu.pipeline_mode<synchronous>, transform_indices = @transform_6, window_bounds = array<i64: 128, 128>}, {pipeline_mode = #tpu.pipeline_mode<synchronous>, transform_indices = @transform_7, window_bounds = array<i64: 1, 128>}, {transform_indices = @transform_8, window_bounds = array<i64: 8, 128>}]} {
    %c0 = arith.constant 0 : index
    %c0_0 = arith.constant 0 : index
    %0 = vector.load %arg1[%c0, %c0_0] : memref<8x128xf32, #tpu.memory_space<vmem>>, vector<8x128xf32>
    %c0_1 = arith.constant 0 : index
    %c0_2 = arith.constant 0 : index
    %1 = vector.load %arg2[%c0_1, %c0_2] : memref<128x2048xf32, #tpu.memory_space<vmem>>, vector<128x2048xf32>
    %cst = arith.constant dense<0.000000e+00> : vector<8x2048xf32>
    %2 = tpu.matmul %0, %1, %cst {dimension_numbers = #tpu.dot_dimension_numbers<[1], [0], [0], [1], [0, 0, 1, 1], [], []>} : vector<8x128xf32>, vector<128x2048xf32>, vector<8x2048xf32> -> vector<8x2048xf32>
    %c0_3 = arith.constant 0 : index
    %c0_4 = arith.constant 0 : index
    %3 = vector.load %arg3[%c0_3, %c0_4] : memref<1x2048xf32, #tpu.memory_space<vmem>>, vector<1x2048xf32>
    %4 = vector.broadcast %3 : vector<1x2048xf32> to vector<8x2048xf32>
    %5 = arith.addf %2, %4 : vector<8x2048xf32>
    %c0_5 = arith.constant 0 : index
    %c0_6 = arith.constant 0 : index
    %6 = vector.load %arg4[%c0_5, %c0_6] : memref<64x256xf32, #tpu.memory_space<vmem>>, vector<64x256xf32>
    %cst_7 = arith.constant 0.000000e+00 : f32
    %7 = vector.broadcast %cst_7 : f32 to vector<8x64xf32>
    %cst_8 = arith.constant 0.000000e+00 : f32
    %8 = vector.broadcast %cst_8 : f32 to vector<8x64xf32>
    %cst_9 = arith.constant dense<0.000000e+00> : vector<8x256xf32>
    %9 = tpu.matmul %7, %6, %cst_9 {dimension_numbers = #tpu.dot_dimension_numbers<[1], [0], [0], [1], [0, 0, 1, 1], [], []>} : vector<8x64xf32>, vector<64x256xf32>, vector<8x256xf32> -> vector<8x256xf32>
    %10 = vector.extract_strided_slice %5 {offsets = [0, 0], sizes = [8, 256], strides = [1, 1]} : vector<8x2048xf32> to vector<8x256xf32>
    %11 = arith.addf %9, %10 : vector<8x256xf32>
    %12 = arith.negf %11 : vector<8x256xf32>
    %13 = math.exp %12 : vector<8x256xf32>
    %cst_10 = arith.constant 1.000000e+00 : f32
    %14 = vector.broadcast %cst_10 : f32 to vector<8x256xf32>
    %15 = arith.addf %14, %13 : vector<8x256xf32>
    %16 = arith.divf %14, %15 : vector<8x256xf32>
    %17 = math.tanh %11 : vector<8x256xf32>
    %18 = vector.extract_strided_slice %16 {offsets = [0, 0], sizes = [8, 64], strides = [1, 1]} : vector<8x256xf32> to vector<8x64xf32>
    %19 = vector.extract_strided_slice %16 {offsets = [0, 64], sizes = [8, 64], strides = [1, 1]} : vector<8x256xf32> to vector<8x64xf32>
    %20 = vector.extract_strided_slice %17 {offsets = [0, 128], sizes = [8, 64], strides = [1, 1]} : vector<8x256xf32> to vector<8x64xf32>
    %21 = vector.extract_strided_slice %16 {offsets = [0, 192], sizes = [8, 64], strides = [1, 1]} : vector<8x256xf32> to vector<8x64xf32>
    %22 = arith.mulf %19, %8 : vector<8x64xf32>
    %23 = arith.mulf %18, %20 : vector<8x64xf32>
    %24 = arith.addf %22, %23 : vector<8x64xf32>
    %25 = math.tanh %24 : vector<8x64xf32>
    %26 = arith.mulf %21, %25 : vector<8x64xf32>
    %cst_11 = arith.constant dense<0.000000e+00> : vector<8x256xf32>
    %27 = tpu.matmul %26, %6, %cst_11 {dimension_numbers = #tpu.dot_dimension_numbers<[1], [0], [0], [1], [0, 0, 1, 1], [], []>} : vector<8x64xf32>, vector<64x256xf32>, vector<8x256xf32> -> vector<8x256xf32>
    %28 = vector.extract_strided_slice %5 {offsets = [0, 256], sizes = [8, 256], strides = [1, 1]} : vector<8x2048xf32> to vector<8x256xf32>
    %29 = arith.addf %27, %28 : vector<8x256xf32>
    %30 = arith.negf %29 : vector<8x256xf32>
    %31 = math.exp %30 : vector<8x256xf32>
    %cst_12 = arith.constant 1.000000e+00 : f32
    %32 = vector.broadcast %cst_12 : f32 to vector<8x256xf32>
    %33 = arith.addf %32, %31 : vector<8x256xf32>
    %34 = arith.divf %32, %33 : vector<8x256xf32>
    %35 = math.tanh %29 : vector<8x256xf32>
    %36 = vector.extract_strided_slice %34 {offsets = [0, 0], sizes = [8, 64], strides = [1, 1]} : vector<8x256xf32> to vector<8x64xf32>
    %37 = vector.extract_strided_slice %34 {offsets = [0, 64], sizes = [8, 64], strides = [1, 1]} : vector<8x256xf32> to vector<8x64xf32>
    %38 = vector.extract_strided_slice %35 {offsets = [0, 128], sizes = [8, 64], strides = [1, 1]} : vector<8x256xf32> to vector<8x64xf32>
    %39 = vector.extract_strided_slice %34 {offsets = [0, 192], sizes = [8, 64], strides = [1, 1]} : vector<8x256xf32> to vector<8x64xf32>
    %40 = arith.mulf %37, %24 : vector<8x64xf32>
    %41 = arith.mulf %36, %38 : vector<8x64xf32>
    %42 = arith.addf %40, %41 : vector<8x64xf32>
    %43 = math.tanh %42 : vector<8x64xf32>
    %44 = arith.mulf %39, %43 : vector<8x64xf32>
    %cst_13 = arith.constant dense<0.000000e+00> : vector<8x256xf32>
    %45 = tpu.matmul %44, %6, %cst_13 {dimension_numbers = #tpu.dot_dimension_numbers<[1], [0], [0], [1], [0, 0, 1, 1], [], []>} : vector<8x64xf32>, vector<64x256xf32>, vector<8x256xf32> -> vector<8x256xf32>
    %46 = vector.extract_strided_slice %5 {offsets = [0, 512], sizes = [8, 256], strides = [1, 1]} : vector<8x2048xf32> to vector<8x256xf32>
    %47 = arith.addf %45, %46 : vector<8x256xf32>
    %48 = arith.negf %47 : vector<8x256xf32>
    %49 = math.exp %48 : vector<8x256xf32>
    %cst_14 = arith.constant 1.000000e+00 : f32
    %50 = vector.broadcast %cst_14 : f32 to vector<8x256xf32>
    %51 = arith.addf %50, %49 : vector<8x256xf32>
    %52 = arith.divf %50, %51 : vector<8x256xf32>
    %53 = math.tanh %47 : vector<8x256xf32>
    %54 = vector.extract_strided_slice %52 {offsets = [0, 0], sizes = [8, 64], strides = [1, 1]} : vector<8x256xf32> to vector<8x64xf32>
    %55 = vector.extract_strided_slice %52 {offsets = [0, 64], sizes = [8, 64], strides = [1, 1]} : vector<8x256xf32> to vector<8x64xf32>
    %56 = vector.extract_strided_slice %53 {offsets = [0, 128], sizes = [8, 64], strides = [1, 1]} : vector<8x256xf32> to vector<8x64xf32>
    %57 = vector.extract_strided_slice %52 {offsets = [0, 192], sizes = [8, 64], strides = [1, 1]} : vector<8x256xf32> to vector<8x64xf32>
    %58 = arith.mulf %55, %42 : vector<8x64xf32>
    %59 = arith.mulf %54, %56 : vector<8x64xf32>
    %60 = arith.addf %58, %59 : vector<8x64xf32>
    %61 = math.tanh %60 : vector<8x64xf32>
    %62 = arith.mulf %57, %61 : vector<8x64xf32>
    %cst_15 = arith.constant dense<0.000000e+00> : vector<8x256xf32>
    %63 = tpu.matmul %62, %6, %cst_15 {dimension_numbers = #tpu.dot_dimension_numbers<[1], [0], [0], [1], [0, 0, 1, 1], [], []>} : vector<8x64xf32>, vector<64x256xf32>, vector<8x256xf32> -> vector<8x256xf32>
    %64 = vector.extract_strided_slice %5 {offsets = [0, 768], sizes = [8, 256], strides = [1, 1]} : vector<8x2048xf32> to vector<8x256xf32>
    %65 = arith.addf %63, %64 : vector<8x256xf32>
    %66 = arith.negf %65 : vector<8x256xf32>
    %67 = math.exp %66 : vector<8x256xf32>
    %cst_16 = arith.constant 1.000000e+00 : f32
    %68 = vector.broadcast %cst_16 : f32 to vector<8x256xf32>
    %69 = arith.addf %68, %67 : vector<8x256xf32>
    %70 = arith.divf %68, %69 : vector<8x256xf32>
    %71 = math.tanh %65 : vector<8x256xf32>
    %72 = vector.extract_strided_slice %70 {offsets = [0, 0], sizes = [8, 64], strides = [1, 1]} : vector<8x256xf32> to vector<8x64xf32>
    %73 = vector.extract_strided_slice %70 {offsets = [0, 64], sizes = [8, 64], strides = [1, 1]} : vector<8x256xf32> to vector<8x64xf32>
    %74 = vector.extract_strided_slice %71 {offsets = [0, 128], sizes = [8, 64], strides = [1, 1]} : vector<8x256xf32> to vector<8x64xf32>
    %75 = vector.extract_strided_slice %70 {offsets = [0, 192], sizes = [8, 64], strides = [1, 1]} : vector<8x256xf32> to vector<8x64xf32>
    %76 = arith.mulf %73, %60 : vector<8x64xf32>
    %77 = arith.mulf %72, %74 : vector<8x64xf32>
    %78 = arith.addf %76, %77 : vector<8x64xf32>
    %79 = math.tanh %78 : vector<8x64xf32>
    %80 = arith.mulf %75, %79 : vector<8x64xf32>
    %cst_17 = arith.constant dense<0.000000e+00> : vector<8x256xf32>
    %81 = tpu.matmul %80, %6, %cst_17 {dimension_numbers = #tpu.dot_dimension_numbers<[1], [0], [0], [1], [0, 0, 1, 1], [], []>} : vector<8x64xf32>, vector<64x256xf32>, vector<8x256xf32> -> vector<8x256xf32>
    %82 = vector.extract_strided_slice %5 {offsets = [0, 1024], sizes = [8, 256], strides = [1, 1]} : vector<8x2048xf32> to vector<8x256xf32>
    %83 = arith.addf %81, %82 : vector<8x256xf32>
    %84 = arith.negf %83 : vector<8x256xf32>
    %85 = math.exp %84 : vector<8x256xf32>
    %cst_18 = arith.constant 1.000000e+00 : f32
    %86 = vector.broadcast %cst_18 : f32 to vector<8x256xf32>
    %87 = arith.addf %86, %85 : vector<8x256xf32>
    %88 = arith.divf %86, %87 : vector<8x256xf32>
    %89 = math.tanh %83 : vector<8x256xf32>
    %90 = vector.extract_strided_slice %88 {offsets = [0, 0], sizes = [8, 64], strides = [1, 1]} : vector<8x256xf32> to vector<8x64xf32>
    %91 = vector.extract_strided_slice %88 {offsets = [0, 64], sizes = [8, 64], strides = [1, 1]} : vector<8x256xf32> to vector<8x64xf32>
    %92 = vector.extract_strided_slice %89 {offsets = [0, 128], sizes = [8, 64], strides = [1, 1]} : vector<8x256xf32> to vector<8x64xf32>
    %93 = vector.extract_strided_slice %88 {offsets = [0, 192], sizes = [8, 64], strides = [1, 1]} : vector<8x256xf32> to vector<8x64xf32>
    %94 = arith.mulf %91, %78 : vector<8x64xf32>
    %95 = arith.mulf %90, %92 : vector<8x64xf32>
    %96 = arith.addf %94, %95 : vector<8x64xf32>
    %97 = math.tanh %96 : vector<8x64xf32>
    %98 = arith.mulf %93, %97 : vector<8x64xf32>
    %cst_19 = arith.constant dense<0.000000e+00> : vector<8x256xf32>
    %99 = tpu.matmul %98, %6, %cst_19 {dimension_numbers = #tpu.dot_dimension_numbers<[1], [0], [0], [1], [0, 0, 1, 1], [], []>} : vector<8x64xf32>, vector<64x256xf32>, vector<8x256xf32> -> vector<8x256xf32>
    %100 = vector.extract_strided_slice %5 {offsets = [0, 1280], sizes = [8, 256], strides = [1, 1]} : vector<8x2048xf32> to vector<8x256xf32>
    %101 = arith.addf %99, %100 : vector<8x256xf32>
    %102 = arith.negf %101 : vector<8x256xf32>
    %103 = math.exp %102 : vector<8x256xf32>
    %cst_20 = arith.constant 1.000000e+00 : f32
    %104 = vector.broadcast %cst_20 : f32 to vector<8x256xf32>
    %105 = arith.addf %104, %103 : vector<8x256xf32>
    %106 = arith.divf %104, %105 : vector<8x256xf32>
    %107 = math.tanh %101 : vector<8x256xf32>
    %108 = vector.extract_strided_slice %106 {offsets = [0, 0], sizes = [8, 64], strides = [1, 1]} : vector<8x256xf32> to vector<8x64xf32>
    %109 = vector.extract_strided_slice %106 {offsets = [0, 64], sizes = [8, 64], strides = [1, 1]} : vector<8x256xf32> to vector<8x64xf32>
    %110 = vector.extract_strided_slice %107 {offsets = [0, 128], sizes = [8, 64], strides = [1, 1]} : vector<8x256xf32> to vector<8x64xf32>
    %111 = vector.extract_strided_slice %106 {offsets = [0, 192], sizes = [8, 64], strides = [1, 1]} : vector<8x256xf32> to vector<8x64xf32>
    %112 = arith.mulf %109, %96 : vector<8x64xf32>
    %113 = arith.mulf %108, %110 : vector<8x64xf32>
    %114 = arith.addf %112, %113 : vector<8x64xf32>
    %115 = math.tanh %114 : vector<8x64xf32>
    %116 = arith.mulf %111, %115 : vector<8x64xf32>
    %cst_21 = arith.constant dense<0.000000e+00> : vector<8x256xf32>
    %117 = tpu.matmul %116, %6, %cst_21 {dimension_numbers = #tpu.dot_dimension_numbers<[1], [0], [0], [1], [0, 0, 1, 1], [], []>} : vector<8x64xf32>, vector<64x256xf32>, vector<8x256xf32> -> vector<8x256xf32>
    %118 = vector.extract_strided_slice %5 {offsets = [0, 1536], sizes = [8, 256], strides = [1, 1]} : vector<8x2048xf32> to vector<8x256xf32>
    %119 = arith.addf %117, %118 : vector<8x256xf32>
    %120 = arith.negf %119 : vector<8x256xf32>
    %121 = math.exp %120 : vector<8x256xf32>
    %cst_22 = arith.constant 1.000000e+00 : f32
    %122 = vector.broadcast %cst_22 : f32 to vector<8x256xf32>
    %123 = arith.addf %122, %121 : vector<8x256xf32>
    %124 = arith.divf %122, %123 : vector<8x256xf32>
    %125 = math.tanh %119 : vector<8x256xf32>
    %126 = vector.extract_strided_slice %124 {offsets = [0, 0], sizes = [8, 64], strides = [1, 1]} : vector<8x256xf32> to vector<8x64xf32>
    %127 = vector.extract_strided_slice %124 {offsets = [0, 64], sizes = [8, 64], strides = [1, 1]} : vector<8x256xf32> to vector<8x64xf32>
    %128 = vector.extract_strided_slice %125 {offsets = [0, 128], sizes = [8, 64], strides = [1, 1]} : vector<8x256xf32> to vector<8x64xf32>
    %129 = vector.extract_strided_slice %124 {offsets = [0, 192], sizes = [8, 64], strides = [1, 1]} : vector<8x256xf32> to vector<8x64xf32>
    %130 = arith.mulf %127, %114 : vector<8x64xf32>
    %131 = arith.mulf %126, %128 : vector<8x64xf32>
    %132 = arith.addf %130, %131 : vector<8x64xf32>
    %133 = math.tanh %132 : vector<8x64xf32>
    %134 = arith.mulf %129, %133 : vector<8x64xf32>
    %cst_23 = arith.constant dense<0.000000e+00> : vector<8x256xf32>
    %135 = tpu.matmul %134, %6, %cst_23 {dimension_numbers = #tpu.dot_dimension_numbers<[1], [0], [0], [1], [0, 0, 1, 1], [], []>} : vector<8x64xf32>, vector<64x256xf32>, vector<8x256xf32> -> vector<8x256xf32>
    %136 = vector.extract_strided_slice %5 {offsets = [0, 1792], sizes = [8, 256], strides = [1, 1]} : vector<8x2048xf32> to vector<8x256xf32>
    %137 = arith.addf %135, %136 : vector<8x256xf32>
    %138 = arith.negf %137 : vector<8x256xf32>
    %139 = math.exp %138 : vector<8x256xf32>
    %cst_24 = arith.constant 1.000000e+00 : f32
    %140 = vector.broadcast %cst_24 : f32 to vector<8x256xf32>
    %141 = arith.addf %140, %139 : vector<8x256xf32>
    %142 = arith.divf %140, %141 : vector<8x256xf32>
    %143 = math.tanh %137 : vector<8x256xf32>
    %144 = vector.extract_strided_slice %142 {offsets = [0, 0], sizes = [8, 64], strides = [1, 1]} : vector<8x256xf32> to vector<8x64xf32>
    %145 = vector.extract_strided_slice %142 {offsets = [0, 64], sizes = [8, 64], strides = [1, 1]} : vector<8x256xf32> to vector<8x64xf32>
    %146 = vector.extract_strided_slice %143 {offsets = [0, 128], sizes = [8, 64], strides = [1, 1]} : vector<8x256xf32> to vector<8x64xf32>
    %147 = vector.extract_strided_slice %142 {offsets = [0, 192], sizes = [8, 64], strides = [1, 1]} : vector<8x256xf32> to vector<8x64xf32>
    %148 = arith.mulf %145, %132 : vector<8x64xf32>
    %149 = arith.mulf %144, %146 : vector<8x64xf32>
    %150 = arith.addf %148, %149 : vector<8x64xf32>
    %151 = math.tanh %150 : vector<8x64xf32>
    %152 = arith.mulf %147, %151 : vector<8x64xf32>
    %cst_25 = arith.constant 0.000000e+00 : f32
    %153 = vector.broadcast %cst_25 : f32 to vector<8x64xf32>
    %154 = arith.cmpf oge, %152, %153 : vector<8x64xf32>
    %cst_26 = arith.constant 3.000000e-01 : f32
    %155 = vector.broadcast %cst_26 : f32 to vector<8x64xf32>
    %156 = arith.mulf %155, %152 : vector<8x64xf32>
    %157 = arith.select %154, %152, %156 : vector<8x64xi1>, vector<8x64xf32>
    %c0_27 = arith.constant 0 : index
    %c0_28 = arith.constant 0 : index
    %158 = vector.load %arg5[%c0_27, %c0_28] : memref<64x128xf32, #tpu.memory_space<vmem>>, vector<64x128xf32>
    %cst_29 = arith.constant dense<0.000000e+00> : vector<8x128xf32>
    %159 = tpu.matmul %157, %158, %cst_29 {dimension_numbers = #tpu.dot_dimension_numbers<[1], [0], [0], [1], [0, 0, 1, 1], [], []>} : vector<8x64xf32>, vector<64x128xf32>, vector<8x128xf32> -> vector<8x128xf32>
    %c0_30 = arith.constant 0 : index
    %c0_31 = arith.constant 0 : index
    %160 = vector.load %arg6[%c0_30, %c0_31] : memref<1x128xf32, #tpu.memory_space<vmem>>, vector<1x128xf32>
    %161 = vector.broadcast %160 : vector<1x128xf32> to vector<8x128xf32>
    %162 = arith.addf %159, %161 : vector<8x128xf32>
    %cst_32 = arith.constant 0.000000e+00 : f32
    %163 = vector.broadcast %cst_32 : f32 to vector<8x128xf32>
    %164 = arith.cmpf oge, %162, %163 : vector<8x128xf32>
    %cst_33 = arith.constant 3.000000e-01 : f32
    %165 = vector.broadcast %cst_33 : f32 to vector<8x128xf32>
    %166 = arith.mulf %165, %162 : vector<8x128xf32>
    %167 = arith.select %164, %162, %166 : vector<8x128xi1>, vector<8x128xf32>
    %c0_34 = arith.constant 0 : index
    %c0_35 = arith.constant 0 : index
    %168 = vector.load %arg7[%c0_34, %c0_35] : memref<128x128xf32, #tpu.memory_space<vmem>>, vector<128x128xf32>
    %cst_36 = arith.constant dense<0.000000e+00> : vector<8x128xf32>
    %169 = tpu.matmul %167, %168, %cst_36 {dimension_numbers = #tpu.dot_dimension_numbers<[1], [0], [0], [1], [0, 0, 1, 1], [], []>} : vector<8x128xf32>, vector<128x128xf32>, vector<8x128xf32> -> vector<8x128xf32>
    %c0_37 = arith.constant 0 : index
    %c0_38 = arith.constant 0 : index
    %170 = vector.load %arg8[%c0_37, %c0_38] : memref<1x128xf32, #tpu.memory_space<vmem>>, vector<1x128xf32>
    %171 = vector.broadcast %170 : vector<1x128xf32> to vector<8x128xf32>
    %172 = arith.addf %169, %171 : vector<8x128xf32>
    %173 = arith.negf %172 : vector<8x128xf32>
    %174 = math.exp %173 : vector<8x128xf32>
    %cst_39 = arith.constant 1.000000e+00 : f32
    %175 = vector.broadcast %cst_39 : f32 to vector<8x128xf32>
    %176 = arith.addf %175, %174 : vector<8x128xf32>
    %177 = arith.divf %175, %176 : vector<8x128xf32>
    %c0_40 = arith.constant 0 : index
    %c0_41 = arith.constant 0 : index
    %178 = vector.load %arg9[%c0_40, %c0_41] : memref<8x128xf32, #tpu.memory_space<vmem>>, vector<8x128xf32>
    tpu.vector_store %arg9[%c0_40, %c0_41], %177 {strides = array<i32>} : memref<8x128xf32, #tpu.memory_space<vmem>>, vector<8x128xf32>,
    return
  }
  func.func @transform_0(%arg0: i32) -> (i32, i32) {
    %c0_i32 = arith.constant 0 : i32
    %c0_i32_0 = arith.constant 0 : i32
    return %arg0, %c0_i32 : i32, i32
  }
  func.func @transform_1(%arg0: i32) -> (i32, i32) {
    %c0_i32 = arith.constant 0 : i32
    %c0_i32_0 = arith.constant 0 : i32
    %c0_i32_1 = arith.constant 0 : i32
    return %c0_i32, %c0_i32_0 : i32, i32
  }
  func.func @transform_2(%arg0: i32) -> (i32, i32) {
    %c0_i32 = arith.constant 0 : i32
    %c0_i32_0 = arith.constant 0 : i32
    %c0_i32_1 = arith.constant 0 : i32
    return %c0_i32, %c0_i32_0 : i32, i32
  }
  func.func @transform_3(%arg0: i32) -> (i32, i32) {
    %c0_i32 = arith.constant 0 : i32
    %c0_i32_0 = arith.constant 0 : i32
    %c0_i32_1 = arith.constant 0 : i32
    return %c0_i32, %c0_i32_0 : i32, i32
  }
  func.func @transform_4(%arg0: i32) -> (i32, i32) {
    %c0_i32 = arith.constant 0 : i32
    %c0_i32_0 = arith.constant 0 : i32
    %c0_i32_1 = arith.constant 0 : i32
    return %c0_i32, %c0_i32_0 : i32, i32
  }
  func.func @transform_5(%arg0: i32) -> (i32, i32) {
    %c0_i32 = arith.constant 0 : i32
    %c0_i32_0 = arith.constant 0 : i32
    %c0_i32_1 = arith.constant 0 : i32
    return %c0_i32, %c0_i32_0 : i32, i32
  }
  func.func @transform_6(%arg0: i32) -> (i32, i32) {
    %c0_i32 = arith.constant 0 : i32
    %c0_i32_0 = arith.constant 0 : i32
    %c0_i32_1 = arith.constant 0 : i32
    return %c0_i32, %c0_i32_0 : i32, i32
  }
  func.func @transform_7(%arg0: i32) -> (i32, i32) {
    %c0_i32 = arith.constant 0 : i32
    %c0_i32_0 = arith.constant 0 : i32
    %c0_i32_1 = arith.constant 0 : i32
    return %c0_i32, %c0_i32_0 : i32, i32
  }
  func.func @transform_8(%arg0: i32) -> (i32, i32) {
    %c0_i32 = arith.constant 0 : i32
    %c0_i32_0 = arith.constant 0 : i32
    return %arg0, %c0_i32 : i32, i32
  }
}

</mosaic_0001>

<bundles_post_ra>
// kernel: tpu_custom_call.1
= control target key start
LH: loop header
LB: loop body
LE: loop exit
PB: predicated region body
PF: predicated region fallthrough
CT: control target
= control target key end

     0   :  { %13 = vsyncpa [#allocation3], 0  ;;  %s3240_s0 = inlined_call_operand.hbm [shape: f32[8,128], index: 0, kind: input, shape index: {}]   ;;  %s3241_s1 = inlined_call_operand.hbm [shape: f32[128,2048], index: 1, kind: input, shape index: {}]   ;;  %s3242_s2 = inlined_call_operand.hbm [shape: f32[1,2048], index: 2, kind: input, shape index: {}]   ;;  %s3243_s3 = inlined_call_operand.hbm [shape: f32[64,256], index: 3, kind: input, shape index: {}]   ;;  %s3244_s4 = inlined_call_operand.hbm [shape: f32[64,128], index: 4, kind: input, shape index: {}]   ;;  %s3245_s5 = inlined_call_operand.vmem [shape: f32[1,128], index: 5, kind: input, shape index: {}]   ;;  %s3246_s6 = inlined_call_operand.hbm [shape: f32[128,128], index: 6, kind: input, shape index: {}]   ;;  %s3247_s7 = inlined_call_operand.vmem [shape: f32[1,128], index: 7, kind: input, shape index: {}]   ;;  %s3248_s8 = inlined_call_operand.hbm [shape: f32[8,128], index: 8, kind: output, shape index: {}]  }
   0x1   :  { %14 = vsyncpa [#allocation6], 0 }
   0x2   :  { %15 = vsyncpa [#allocation9], 0 }
   0x3   :  { %16 = vsyncpa [#allocation12], 0 }
   0x4   :  { %17 = vsyncpa [#allocation4], 0  ;;  %s2870_s27 = smov [#allocation5]   ;;  %s2706_s9 = scalar_lea.hbm %s3241_s1, 32768 }
   0x5   :  { %s33_s28 = sshll.u32 %s2870_s27, 4  ;;  %p2707_p0 = scmp.ne.s32.totalorder %s3241_s1, %s2706_s9  ;;  %s34_s28 = int_to_ptr.vmem [resolvable:$true] %s33_s28 }
   0x6   :  { %p2710_p1 = scmp.lt.u32.totalorder %s2706_s9, %s3241_s1 }
   0x8   :  { %p2712_p2 = pnand %p2710_p1, %p2707_p0 }
   0xa   :  { %2715 = shalt.err (!%p2712_p2)
}
   0xb   :  { %s2716_s14 = scalar_lea.vmem %s34_s28, 32768  ;;  %p2721_p4 = scmp.lt.s32.totalorder %s34_s28, %s34_s28 }
   0xc   :  { %p2717_p3 = scmp.ne.s32.totalorder %s34_s28, %s2716_s14  ;;  %p2722_p5 = scmp.lt.s32.totalorder %s2716_s14, %s2716_s14 }
   0xe   :  { %p2723_p6 = por %p2722_p5, %p2721_p4 }
  0x10   :  { %p2724_p7 = pnand %p2723_p6, %p2717_p3 }
  0x12   :  { %2727 = shalt.err (!%p2724_p7)
}
  0x13   :  { %s2871_s15 = smov 2048   ;;  %s2872_s16 = smov 128  }
  0x14   :  { %39 = dma.hbm_to_vmem [thread:$0]  %s3241_s1, 32768, %s34_s28, [#allocation6], %s2871_s15, %s2871_s15, %s2872_s16  }
  0x15   :  { %s2873_s19 = smov [#allocation8]   ;;  %s2728_s23 = scalar_lea.hbm %s3243_s3, 2048 }
  0x16   :  { %s55_s20 = sshll.u32 %s2873_s19, 4  ;;  %p2729_p8 = scmp.ne.s32.totalorder %s3243_s3, %s2728_s23  ;;  %s56_s20 = int_to_ptr.vmem [resolvable:$true] %s55_s20 }
  0x17   :  { %p2732_p9 = scmp.lt.u32.totalorder %s2728_s23, %s3243_s3 }
  0x19   :  { %p2734_p10 = pnand %p2732_p9, %p2729_p8 }
  0x1b   :  { %2737 = shalt.err (!%p2734_p10)
}
  0x1c   :  { %s2738_s29 = scalar_lea.vmem %s56_s20, 2048  ;;  %p2743_p12 = scmp.lt.s32.totalorder %s56_s20, %s56_s20 }
  0x1d   :  { %p2739_p11 = scmp.ne.s32.totalorder %s56_s20, %s2738_s29  ;;  %p2744_p13 = scmp.lt.s32.totalorder %s2738_s29, %s2738_s29 }
  0x1f   :  { %p2745_p0 = por %p2744_p13, %p2743_p12 }
  0x21   :  { %p2746_p1 = pnand %p2745_p0, %p2739_p11 }
  0x23   :  { %2749 = shalt.err (!%p2746_p1)
}
  0x24   :  { %s2874_s1 = smov 256   ;;  %s2875_s28 = smov 16  }
  0x25   :  { %61 = dma.hbm_to_vmem [thread:$0]  %s3243_s3, 2048, %s56_s20, [#allocation9], %s2874_s1, %s2874_s1, %s2875_s28  }
  0x26   :  { %s2876_s10 = smov [#allocation2]   ;;  %s2877_s12 = smov [#allocation7]  }
  0x27   :  { %s24_s11 = sshll.u32 %s2876_s10, 4  ;;  %s46_s13 = sshll.u32 %s2877_s12, 4  ;;  %s25_s11 = int_to_ptr.vmem [resolvable:$true] %s24_s11  ;;  %s47_s13 = int_to_ptr.vmem [resolvable:$true] %s46_s13 }
  0x28   :  { %s2750_s17 = scalar_lea.hbm %s3240_s0, 128 }
  0x29   :  { %p2751_p2 = scmp.ne.s32.totalorder %s3240_s0, %s2750_s17  ;;  %p2754_p3 = scmp.lt.u32.totalorder %s2750_s17, %s3240_s0 }
  0x2b   :  { %p2756_p4 = pnand %p2754_p3, %p2751_p2 }
  0x2d   :  { %2759 = shalt.err (!%p2756_p4)
}
  0x2e   :  { %s2760_s3 = scalar_lea.vmem %s25_s11, 128  ;;  %p2765_p6 = scmp.lt.s32.totalorder %s25_s11, %s25_s11 }
  0x2f   :  { %p2761_p5 = scmp.ne.s32.totalorder %s25_s11, %s2760_s3  ;;  %p2766_p7 = scmp.lt.s32.totalorder %s2760_s3, %s2760_s3 }
  0x31   :  { %p2767_p8 = por %p2766_p7, %p2765_p6 }
  0x33   :  { %p2768_p9 = pnand %p2767_p8, %p2761_p5 }
  0x35   :  { %2771 = shalt.err (!%p2768_p9)
}
  0x36   :  { %27 = dma.hbm_to_vmem [thread:$0]  %s3240_s0, 128, %s25_s11, [#allocation3]  }
  0x37   :  { %s2772_s26 = scalar_lea.hbm %s3242_s2, 256 }
  0x38   :  { %p2773_p10 = scmp.ne.s32.totalorder %s3242_s2, %s2772_s26  ;;  %p2776_p11 = scmp.lt.u32.totalorder %s2772_s26, %s3242_s2 }
  0x3a   :  { %p2778_p12 = pnand %p2776_p11, %p2773_p10 }
  0x3c   :  { %2781 = shalt.err (!%p2778_p12)
}
  0x3d   :  { %s2782_s30 = scalar_lea.vmem %s47_s13, 256  ;;  %p2787_p0 = scmp.lt.s32.totalorder %s47_s13, %s47_s13 }
  0x3e   :  { %p2783_p13 = scmp.ne.s32.totalorder %s47_s13, %s2782_s30  ;;  %p2788_p1 = scmp.lt.s32.totalorder %s2782_s30, %s2782_s30 }
  0x40   :  { %p2789_p2 = por %p2788_p1, %p2787_p0 }
  0x42   :  { %p2790_p3 = pnand %p2789_p2, %p2783_p13 }
  0x44   :  { %2793 = shalt.err (!%p2790_p3)
}
  0x45   :  { %49 = dma.hbm_to_vmem [thread:$0]  %s3242_s2, 256, %s47_s13, [#allocation6]  }
  0x46   :  { %s2878_s10 = smov [#allocation10]   ;;  %s2879_s12 = smov [#allocation11]  }
  0x47   :  { %s67_s11 = sshll.u32 %s2878_s10, 4  ;;  %s81_s14 = sshll.u32 %s2879_s12, 4  ;;  %s68_s11 = int_to_ptr.vmem [resolvable:$true] %s67_s11  ;;  %s82_s14 = int_to_ptr.vmem [resolvable:$true] %s81_s14 }
  0x48   :  { %s2794_s18 = scalar_lea.hbm %s3244_s4, 1024 }
  0x49   :  { %p2795_p4 = scmp.ne.s32.totalorder %s3244_s4, %s2794_s18  ;;  %p2798_p5 = scmp.lt.u32.totalorder %s2794_s18, %s3244_s4 }
  0x4b   :  { %p2800_p6 = pnand %p2798_p5, %p2795_p4 }
  0x4d   :  { %2803 = shalt.err (!%p2800_p6)
}
  0x4e   :  { %s2804_s2 = scalar_lea.vmem %s68_s11, 1024  ;;  %p2809_p8 = scmp.lt.s32.totalorder %s68_s11, %s68_s11 }
  0x4f   :  { %p2805_p7 = scmp.ne.s32.totalorder %s68_s11, %s2804_s2  ;;  %p2810_p9 = scmp.lt.s32.totalorder %s2804_s2, %s2804_s2 }
  0x51   :  { %p2811_p10 = por %p2810_p9, %p2809_p8 }
  0x53   :  { %p2812_p11 = pnand %p2811_p10, %p2805_p7 }
  0x55   :  { %2815 = shalt.err (!%p2812_p11)
}
  0x56   :  { %s2880_s13 = smov 8   ;;  %s2816_s26 = scalar_lea.hbm %s3246_s6, 2048 }
  0x57   :  { %73 = dma.hbm_to_vmem [thread:$0]  %s3244_s4, 1024, %s68_s11, [#allocation9], %s2872_s16, %s2872_s16, %s2880_s13  }
  0x58   :  { %p2817_p12 = scmp.ne.s32.totalorder %s3246_s6, %s2816_s26  ;;  %p2820_p13 = scmp.lt.u32.totalorder %s2816_s26, %s3246_s6 }
  0x5a   :  { %p2822_p0 = pnand %p2820_p13, %p2817_p12 }
  0x5c   :  { %2825 = shalt.err (!%p2822_p0)
}
  0x5d   :  { %s2826_s30 = scalar_lea.vmem %s82_s14, 2048  ;;  %p2831_p2 = scmp.lt.s32.totalorder %s82_s14, %s82_s14 }
  0x5e   :  { %p2827_p1 = scmp.ne.s32.totalorder %s82_s14, %s2826_s30  ;;  %p2832_p3 = scmp.lt.s32.totalorder %s2826_s30, %s2826_s30 }
  0x60   :  { %p2833_p4 = por %p2832_p3, %p2831_p2 }
  0x62   :  { %p2834_p5 = pnand %p2833_p4, %p2827_p1 }
  0x64   :  { %2837 = shalt.err (!%p2834_p5)
}
  0x65   :  { %87 = dma.hbm_to_vmem [thread:$0]  %s3246_s6, 2048, %s82_s14, [#allocation12], %s2872_s16, %s2872_s16, %s2880_s13  }
  0x66   :  { %2860 = dma.done.wait [#allocation3], 128  }
  0x67   :  { %2861 = vsyncadd [#allocation3], 4294967168 }
  0x68   :  { %2862 = dma.done.wait [#allocation6], 33024  }
  0x69   :  { %2863 = vsyncadd [#allocation6], 4294934272 }
  0x6a   :  { %2864 = dma.done.wait [#allocation9], 3072  }
  0x6b   :  { %2865 = vsyncadd [#allocation9], 4294964224 }
  0x6c   :  { %2866 = dma.done.wait [#allocation12], 2048  }
  0x6d   :  { %2867 = vsyncadd [#allocation12], 4294965248  ;;  %v2881_v0 = vmov 0.0   ;;  %v110_v1 = vld [vmem:[#allocation5 + $0x8] sm:$0xff]  ;;  %v109_v3 = vld [vmem:[#allocation5] sm:$0xff]  ;;  %s2882_s6 = smov 64  }
  0x6e   :  { %513 = vmatprep.mubr.f32.mxu0 %v2881_v0  ;;  %584 = vmatprep.mubr.f32.mxu1 %v2881_v0  ;;  %v126_v2 = vld [vmem:[#allocation5 + $0x88] sm:$0xff]  ;;  %v125_v5 = vld [vmem:[#allocation5 + $0x80] sm:$0xff]  ;;  %v3010_v56 = vld [vmem:[#allocation2] sm:$0xff]  ;;  %vm1033_vm0 = vcmask 523264   ;;  %vm2884_vm1 = vmmov 0  }
  0x6f   :  { %v2137_v4 = vpack.c.bf16 %v126_v2, %v110_v1  ;;  %v142_v6 = vld [vmem:[#allocation5 + $0x108] sm:$0xff]  ;;  %v2139_v8 = vpack.c.bf16 %v125_v5, %v109_v3  ;;  %v141_v10 = vld [vmem:[#allocation5 + $0x100] sm:$0xff] }
  0x70   :  { %v158_v7 = vld [vmem:[#allocation5 + $0x188] sm:$0xff]  ;;  %v157_v11 = vld [vmem:[#allocation5 + $0x180] sm:$0xff] }
  0x71   :  { %v2141_v9 = vpack.c.bf16 %v158_v7, %v142_v6  ;;  %v174_v12 = vld [vmem:[#allocation5 + $0x208] sm:$0xff]  ;;  %2138 = vmatprep.subr.bf16.mxu0 %v2137_v4  ;;  %v2143_v14 = vpack.c.bf16 %v157_v11, %v141_v10  ;;  %v173_v16 = vld [vmem:[#allocation5 + $0x200] sm:$0xff] }
  0x72   :  { %v190_v13 = vld [vmem:[#allocation5 + $0x288] sm:$0xff]  ;;  %2140 = vmatpush1.bf16.msra.mxu0 %v2139_v8  ;;  %v189_v17 = vld [vmem:[#allocation5 + $0x280] sm:$0xff] }
  0x73   :  { %2142 = vmatprep.subr.bf16.mxu0 %v2141_v9  ;;  %v2145_v15 = vpack.c.bf16 %v190_v13, %v174_v12  ;;  %v206_v18 = vld [vmem:[#allocation5 + $0x308] sm:$0xff]  ;;  %v2147_v20 = vpack.c.bf16 %v189_v17, %v173_v16  ;;  %v205_v22 = vld [vmem:[#allocation5 + $0x300] sm:$0xff] }
  0x74   :  { %v222_v19 = vld [vmem:[#allocation5 + $0x388] sm:$0xff]  ;;  %v221_v23 = vld [vmem:[#allocation5 + $0x380] sm:$0xff] }
  0x75   :  { %v2149_v21 = vpack.c.bf16 %v222_v19, %v206_v18  ;;  %v238_v24 = vld [vmem:[#allocation5 + $0x408] sm:$0xff]  ;;  %v2151_v26 = vpack.c.bf16 %v221_v23, %v205_v22  ;;  %v237_v28 = vld [vmem:[#allocation5 + $0x400] sm:$0xff] }
  0x76   :  { %2144 = vmatpush1.bf16.msra.mxu0 %v2143_v14  ;;  %v254_v25 = vld [vmem:[#allocation5 + $0x488] sm:$0xff]  ;;  %v253_v29 = vld [vmem:[#allocation5 + $0x480] sm:$0xff] }
  0x77   :  { %2146 = vmatprep.subr.bf16.mxu0 %v2145_v15  ;;  %v2153_v27 = vpack.c.bf16 %v254_v25, %v238_v24  ;;  %v270_v30 = vld [vmem:[#allocation5 + $0x508] sm:$0xff]  ;;  %v2155_v32 = vpack.c.bf16 %v253_v29, %v237_v28  ;;  %v269_v34 = vld [vmem:[#allocation5 + $0x500] sm:$0xff] }
  0x78   :  { %v286_v31 = vld [vmem:[#allocation5 + $0x588] sm:$0xff]  ;;  %v285_v35 = vld [vmem:[#allocation5 + $0x580] sm:$0xff] }
  0x79   :  { %v2157_v33 = vpack.c.bf16 %v286_v31, %v270_v30  ;;  %v302_v36 = vld [vmem:[#allocation5 + $0x608] sm:$0xff]  ;;  %v2159_v38 = vpack.c.bf16 %v285_v35, %v269_v34  ;;  %v301_v40 = vld [vmem:[#allocation5 + $0x600] sm:$0xff] }
  0x7a   :  { %2148 = vmatpush1.bf16.msra.mxu0 %v2147_v20  ;;  %v318_v37 = vld [vmem:[#allocation5 + $0x688] sm:$0xff]  ;;  %v317_v41 = vld [vmem:[#allocation5 + $0x680] sm:$0xff] }
  0x7b   :  { %2150 = vmatprep.subr.bf16.mxu0 %v2149_v21  ;;  %v2161_v39 = vpack.c.bf16 %v318_v37, %v302_v36  ;;  %v334_v42 = vld [vmem:[#allocation5 + $0x708] sm:$0xff]  ;;  %v2163_v44 = vpack.c.bf16 %v317_v41, %v301_v40  ;;  %v333_v46 = vld [vmem:[#allocation5 + $0x700] sm:$0xff] }
  0x7c   :  { %v350_v43 = vld [vmem:[#allocation5 + $0x788] sm:$0xff]  ;;  %v349_v47 = vld [vmem:[#allocation5 + $0x780] sm:$0xff] }
  0x7d   :  { %v2165_v45 = vpack.c.bf16 %v350_v43, %v334_v42  ;;  %v114_v48 = vld [vmem:[#allocation5 + $0x28] sm:$0xff]  ;;  %v2167_v50 = vpack.c.bf16 %v349_v47, %v333_v46  ;;  %v113_v52 = vld [vmem:[#allocation5 + $0x20] sm:$0xff] }
  0x7e   :  { %2152 = vmatpush1.bf16.msra.mxu0 %v2151_v26  ;;  %v130_v49 = vld [vmem:[#allocation5 + $0xa8] sm:$0xff]  ;;  %v129_v53 = vld [vmem:[#allocation5 + $0xa0] sm:$0xff] }
  0x7f   :  { %2154 = vmatprep.subr.bf16.mxu0 %v2153_v27  ;;  %v2201_v51 = vpack.c.bf16 %v130_v49, %v114_v48  ;;  %v146_v54 = vld [vmem:[#allocation5 + $0x128] sm:$0xff]  ;;  %v2203_v57 = vpack.c.bf16 %v129_v53, %v113_v52  ;;  %v145_v59 = vld [vmem:[#allocation5 + $0x120] sm:$0xff] }
  0x80   :  { %v162_v55 = vld [vmem:[#allocation5 + $0x1a8] sm:$0xff]  ;;  %v161_v60 = vld [vmem:[#allocation5 + $0x1a0] sm:$0xff] }
  0x81   :  { %v2205_v58 = vpack.c.bf16 %v162_v55, %v146_v54  ;;  %v178_v61 = vld [vmem:[#allocation5 + $0x228] sm:$0xff]  ;;  %v2207_v63 = vpack.c.bf16 %v161_v60, %v145_v59  ;;  %v177_v2 = vld [vmem:[#allocation5 + $0x220] sm:$0xff] }
  0x82   :  { %2156 = vmatpush1.bf16.msra.mxu0 %v2155_v32  ;;  %v194_v62 = vld [vmem:[#allocation5 + $0x2a8] sm:$0xff]  ;;  %v193_v3 = vld [vmem:[#allocation5 + $0x2a0] sm:$0xff] }
  0x83   :  { %2158 = vmatprep.subr.bf16.mxu0 %v2157_v33  ;;  %v2209_v1 = vpack.c.bf16 %v194_v62, %v178_v61  ;;  %v210_v4 = vld [vmem:[#allocation5 + $0x328] sm:$0xff]  ;;  %v2211_v6 = vpack.c.bf16 %v193_v3, %v177_v2  ;;  %v209_v8 = vld [vmem:[#allocation5 + $0x320] sm:$0xff] }
  0x84   :  { %v226_v5 = vld [vmem:[#allocation5 + $0x3a8] sm:$0xff]  ;;  %v225_v9 = vld [vmem:[#allocation5 + $0x3a0] sm:$0xff] }
  0x85   :  { %v2213_v7 = vpack.c.bf16 %v226_v5, %v210_v4  ;;  %v242_v10 = vld [vmem:[#allocation5 + $0x428] sm:$0xff]  ;;  %v2215_v12 = vpack.c.bf16 %v225_v9, %v209_v8  ;;  %v241_v14 = vld [vmem:[#allocation5 + $0x420] sm:$0xff] }
  0x86   :  { %2160 = vmatpush1.bf16.msra.mxu0 %v2159_v38  ;;  %v258_v11 = vld [vmem:[#allocation5 + $0x4a8] sm:$0xff]  ;;  %v257_v15 = vld [vmem:[#allocation5 + $0x4a0] sm:$0xff] }
  0x87   :  { %2162 = vmatprep.subr.bf16.mxu0 %v2161_v39  ;;  %v2217_v13 = vpack.c.bf16 %v258_v11, %v242_v10  ;;  %v274_v16 = vld [vmem:[#allocation5 + $0x528] sm:$0xff]  ;;  %v2219_v18 = vpack.c.bf16 %v257_v15, %v241_v14  ;;  %v273_v20 = vld [vmem:[#allocation5 + $0x520] sm:$0xff] }
  0x88   :  { %v290_v17 = vld [vmem:[#allocation5 + $0x5a8] sm:$0xff]  ;;  %v289_v21 = vld [vmem:[#allocation5 + $0x5a0] sm:$0xff] }
  0x89   :  { %v2221_v19 = vpack.c.bf16 %v290_v17, %v274_v16  ;;  %v306_v22 = vld [vmem:[#allocation5 + $0x628] sm:$0xff]  ;;  %v2223_v24 = vpack.c.bf16 %v289_v21, %v273_v20  ;;  %v305_v26 = vld [vmem:[#allocation5 + $0x620] sm:$0xff] }
  0x8a   :  { %2164 = vmatpush1.bf16.msra.mxu0 %v2163_v44  ;;  %v322_v23 = vld [vmem:[#allocation5 + $0x6a8] sm:$0xff]  ;;  %v321_v27 = vld [vmem:[#allocation5 + $0x6a0] sm:$0xff] }
  0x8b   :  { %2166 = vmatprep.subr.bf16.mxu0 %v2165_v45  ;;  %v2225_v25 = vpack.c.bf16 %v322_v23, %v306_v22  ;;  %v338_v28 = vld [vmem:[#allocation5 + $0x728] sm:$0xff]  ;;  %v2227_v30 = vpack.c.bf16 %v321_v27, %v305_v26  ;;  %v337_v32 = vld [vmem:[#allocation5 + $0x720] sm:$0xff] }
  0x8c   :  { %v354_v29 = vld [vmem:[#allocation5 + $0x7a8] sm:$0xff]  ;;  %v353_v33 = vld [vmem:[#allocation5 + $0x7a0] sm:$0xff] }
  0x8d   :  { %v2229_v31 = vpack.c.bf16 %v354_v29, %v338_v28  ;;  %v118_v34 = vld [vmem:[#allocation5 + $0x48] sm:$0xff]  ;;  %v2231_v36 = vpack.c.bf16 %v353_v33, %v337_v32  ;;  %v117_v38 = vld [vmem:[#allocation5 + $0x40] sm:$0xff] }
  0x8e   :  { %2168 = vmatpush1.bf16.msra.mxu0 %v2167_v50  ;;  %v134_v35 = vld [vmem:[#allocation5 + $0xc8] sm:$0xff]  ;;  %v133_v39 = vld [vmem:[#allocation5 + $0xc0] sm:$0xff] }
  0x8f   :  { %2202 = vmatprep.subr.bf16.mxu0 %v2201_v51  ;;  %v2265_v37 = vpack.c.bf16 %v134_v35, %v118_v34  ;;  %v150_v40 = vld [vmem:[#allocation5 + $0x148] sm:$0xff]  ;;  %v2267_v42 = vpack.c.bf16 %v133_v39, %v117_v38  ;;  %v149_v44 = vld [vmem:[#allocation5 + $0x140] sm:$0xff] }
  0x90   :  { %v166_v41 = vld [vmem:[#allocation5 + $0x1c8] sm:$0xff]  ;;  %v165_v45 = vld [vmem:[#allocation5 + $0x1c0] sm:$0xff] }
  0x91   :  { %514 = vmatmul.mubr.f32.vlgmr.msra.gmra.mrb[0].mxu0 %v3010_v56  ;;  %v2269_v43 = vpack.c.bf16 %v166_v41, %v150_v40  ;;  %v182_v46 = vld [vmem:[#allocation5 + $0x248] sm:$0xff]  ;;  %v2271_v48 = vpack.c.bf16 %v165_v45, %v149_v44  ;;  %v181_v50 = vld [vmem:[#allocation5 + $0x240] sm:$0xff] }
  0x92   :  { %2204 = vmatpush1.bf16.msra.mxu0 %v2203_v57  ;;  %655 = vmatprep.mubr.f32.mxu0 %v2881_v0  ;;  %v198_v47 = vld [vmem:[#allocation5 + $0x2c8] sm:$0xff]  ;;  %v197_v51 = vld [vmem:[#allocation5 + $0x2c0] sm:$0xff] }
  0x93   :  { %2206 = vmatprep.subr.bf16.mxu0 %v2205_v58  ;;  %v2273_v49 = vpack.c.bf16 %v198_v47, %v182_v46  ;;  %v214_v52 = vld [vmem:[#allocation5 + $0x348] sm:$0xff]  ;;  %v2275_v54 = vpack.c.bf16 %v197_v51, %v181_v50  ;;  %v213_v57 = vld [vmem:[#allocation5 + $0x340] sm:$0xff] }
  0x94   :  { %v230_v53 = vld [vmem:[#allocation5 + $0x3c8] sm:$0xff]  ;;  %v229_v58 = vld [vmem:[#allocation5 + $0x3c0] sm:$0xff] }
  0x95   :  { %v2277_v55 = vpack.c.bf16 %v230_v53, %v214_v52  ;;  %v246_v59 = vld [vmem:[#allocation5 + $0x448] sm:$0xff]  ;;  %v2279_v61 = vpack.c.bf16 %v229_v58, %v213_v57 }
  0x96   :  { %2208 = vmatpush1.bf16.msra.mxu0 %v2207_v63  ;;  %v262_v60 = vld [vmem:[#allocation5 + $0x4c8] sm:$0xff]  ;;  %v245_v63 = vld [vmem:[#allocation5 + $0x440] sm:$0xff] }
  0x97   :  { %2210 = vmatprep.subr.bf16.mxu0 %v2209_v1  ;;  %v2281_v62 = vpack.c.bf16 %v262_v60, %v246_v59  ;;  %v261_v1 = vld [vmem:[#allocation5 + $0x4c0] sm:$0xff]  ;;  %v278_v2 = vld [vmem:[#allocation5 + $0x548] sm:$0xff] }
  0x98   :  { %v294_v3 = vld [vmem:[#allocation5 + $0x5c8] sm:$0xff]  ;;  %v2283_v4 = vpack.c.bf16 %v261_v1, %v245_v63 }
  0x99   :  { %v2285_v5 = vpack.c.bf16 %v294_v3, %v278_v2  ;;  %v310_v8 = vld [vmem:[#allocation5 + $0x648] sm:$0xff] }
  0x9a   :  { %2212 = vmatpush1.bf16.msra.mxu0 %v2211_v6  ;;  %v277_v6 = vld [vmem:[#allocation5 + $0x540] sm:$0xff]  ;;  %v326_v9 = vld [vmem:[#allocation5 + $0x6c8] sm:$0xff] }
  0x9b   :  { %2214 = vmatprep.subr.bf16.mxu0 %v2213_v7  ;;  %v293_v7 = vld [vmem:[#allocation5 + $0x5c0] sm:$0xff]  ;;  %v2289_v11 = vpack.c.bf16 %v326_v9, %v310_v8  ;;  %v342_v14 = vld [vmem:[#allocation5 + $0x748] sm:$0xff] }
  0x9c   :  { %v2287_v10 = vpack.c.bf16 %v293_v7, %v277_v6  ;;  %v358_v15 = vld [vmem:[#allocation5 + $0x7c8] sm:$0xff]  ;;  %v1018_v6 = vld [vmem:[#allocation8 + $0x8] sm:$0xff] }
  0x9d   :  { %v2293_v17 = vpack.c.bf16 %v358_v15, %v342_v14  ;;  %v122_v20 = vld [vmem:[#allocation5 + $0x68] sm:$0xff] }
  0x9e   :  { %2216 = vmatpush1.bf16.msra.mxu0 %v2215_v12  ;;  %v309_v12 = vld [vmem:[#allocation5 + $0x640] sm:$0xff]  ;;  %v138_v21 = vld [vmem:[#allocation5 + $0xe8] sm:$0xff] }
  0x9f   :  { %2218 = vmatprep.subr.bf16.mxu0 %v2217_v13  ;;  %v325_v13 = vld [vmem:[#allocation5 + $0x6c0] sm:$0xff]  ;;  %v2329_v23 = vpack.c.bf16 %v138_v21, %v122_v20  ;;  %v154_v26 = vld [vmem:[#allocation5 + $0x168] sm:$0xff] }
  0xa0   :  { %v2291_v16 = vpack.c.bf16 %v325_v13, %v309_v12  ;;  %v170_v27 = vld [vmem:[#allocation5 + $0x1e8] sm:$0xff]  ;;  %v1022_v12 = vld [vmem:[#allocation8 + $0x28] sm:$0xff] }
  0xa1   :  { %v2333_v29 = vpack.c.bf16 %v170_v27, %v154_v26  ;;  %v186_v32 = vld [vmem:[#allocation5 + $0x268] sm:$0xff] }
  0xa2   :  { %2220 = vmatpush1.bf16.msra.mxu0 %v2219_v18  ;;  %v341_v18 = vld [vmem:[#allocation5 + $0x740] sm:$0xff]  ;;  %v202_v33 = vld [vmem:[#allocation5 + $0x2e8] sm:$0xff] }
  0xa3   :  { %2222 = vmatprep.subr.bf16.mxu0 %v2221_v19  ;;  %v357_v19 = vld [vmem:[#allocation5 + $0x7c0] sm:$0xff]  ;;  %v2337_v35 = vpack.c.bf16 %v202_v33, %v186_v32  ;;  %v218_v38 = vld [vmem:[#allocation5 + $0x368] sm:$0xff]  ;;  %v128_v32 = vld [vmem:[#allocation5 + $0x98] sm:$0xff] }
  0xa4   :  { %v2295_v22 = vpack.c.bf16 %v357_v19, %v341_v18  ;;  %v234_v39 = vld [vmem:[#allocation5 + $0x3e8] sm:$0xff]  ;;  %v1026_v18 = vld [vmem:[#allocation8 + $0x48] sm:$0xff]  ;;  %v111_v33 = vld [vmem:[#allocation5 + $0x10] sm:$0xff] }
  0xa5   :  { %v2341_v41 = vpack.c.bf16 %v234_v39, %v218_v38  ;;  %v250_v44 = vld [vmem:[#allocation5 + $0x468] sm:$0xff] }
  0xa6   :  { %2224 = vmatpush1.bf16.msra.mxu0 %v2223_v24  ;;  %v121_v24 = vld [vmem:[#allocation5 + $0x60] sm:$0xff]  ;;  %v266_v45 = vld [vmem:[#allocation5 + $0x4e8] sm:$0xff] }
  0xa7   :  { %2226 = vmatprep.subr.bf16.mxu0 %v2225_v25  ;;  %v137_v25 = vld [vmem:[#allocation5 + $0xe0] sm:$0xff]  ;;  %v2345_v47 = vpack.c.bf16 %v266_v45, %v250_v44  ;;  %v282_v50 = vld [vmem:[#allocation5 + $0x568] sm:$0xff] }
  0xa8   :  { %v2331_v28 = vpack.c.bf16 %v137_v25, %v121_v24  ;;  %v298_v51 = vld [vmem:[#allocation5 + $0x5e8] sm:$0xff]  ;;  %v1030_v24 = vld [vmem:[#allocation8 + $0x68] sm:$0xff] }
  0xa9   :  { %v2349_v53 = vpack.c.bf16 %v298_v51, %v282_v50  ;;  %v314_v57 = vld [vmem:[#allocation5 + $0x668] sm:$0xff] }
  0xaa   :  { %2228 = vmatpush1.bf16.msra.mxu0 %v2227_v30  ;;  %v153_v30 = vld [vmem:[#allocation5 + $0x160] sm:$0xff]  ;;  %v330_v58 = vld [vmem:[#allocation5 + $0x6e8] sm:$0xff] }
  0xab   :  { %2230 = vmatprep.subr.bf16.mxu0 %v2229_v31  ;;  %v169_v31 = vld [vmem:[#allocation5 + $0x1e0] sm:$0xff]  ;;  %v2353_v60 = vpack.c.bf16 %v330_v58, %v314_v57  ;;  %v346_v63 = vld [vmem:[#allocation5 + $0x768] sm:$0xff] }
  0xac   :  { %v2335_v34 = vpack.c.bf16 %v169_v31, %v153_v30  ;;  %v362_v1 = vld [vmem:[#allocation5 + $0x7e8] sm:$0xff]  ;;  %v112_v31 = vld [vmem:[#allocation5 + $0x18] sm:$0xff] }
  0xad   :  { %v2357_v3 = vpack.c.bf16 %v362_v1, %v346_v63  ;;  %v1020_v7 = vld [vmem:[#allocation8 + $0x18] sm:$0xff] }
  0xae   :  { %2232 = vmatpush1.bf16.msra.mxu0 %v2231_v36  ;;  %v185_v36 = vld [vmem:[#allocation5 + $0x260] sm:$0xff]  ;;  %v3018_v9 = vpack.c.bf16 %v1020_v7, %v1018_v6  ;;  %v1024_v13 = vld [vmem:[#allocation8 + $0x38] sm:$0xff]  ;;  %v240_v7 = vld [vmem:[#allocation5 + $0x418] sm:$0xff] }
  0xaf   :  { %2266 = vmatprep.subr.bf16.mxu0 %v2265_v37  ;;  %v201_v37 = vld [vmem:[#allocation5 + $0x2e0] sm:$0xff]  ;;  %v3023_v15 = vpack.c.bf16 %v1024_v13, %v1022_v12  ;;  %v1028_v19 = vld [vmem:[#allocation8 + $0x58] sm:$0xff]  ;;  %v255_v12 = vld [vmem:[#allocation5 + $0x490] sm:$0xff] }
  0xb0   :  { %v2339_v40 = vpack.c.bf16 %v201_v37, %v185_v36  ;;  %v3031_v21 = vpack.c.bf16 %v1028_v19, %v1026_v18  ;;  %v1032_v25 = vld [vmem:[#allocation8 + $0x78] sm:$0xff]  ;;  %v144_v36 = vld [vmem:[#allocation5 + $0x118] sm:$0xff]  ;;  %v271_v18 = vld [vmem:[#allocation5 + $0x510] sm:$0xff] }
  0xb1   :  { %656 = vmatmul.mubr.f32.vlgmr.msra.gmra.mrb[2].mxu0 %v3010_v56  ;;  %v3037_v27 = vpack.c.bf16 %v1032_v25, %v1030_v24  ;;  %v160_v37 = vld [vmem:[#allocation5 + $0x198] sm:$0xff] }
  0xb2   :  { %2268 = vmatpush1.bf16.msra.mxu0 %v2267_v42  ;;  %797 = vmatprep.mubr.f32.mxu0 %v2881_v0  ;;  %v217_v42 = vld [vmem:[#allocation5 + $0x360] sm:$0xff]  ;;  %v2173_v39 = vpack.c.bf16 %v160_v37, %v144_v36  ;;  %v320_v24 = vld [vmem:[#allocation5 + $0x698] sm:$0xff]  ;;  %v335_v36 = vld [vmem:[#allocation5 + $0x710] sm:$0xff] }
  0xb3   :  { %2270 = vmatprep.subr.bf16.mxu0 %v2269_v43  ;;  %v233_v43 = vld [vmem:[#allocation5 + $0x3e0] sm:$0xff]  ;;  %v351_v37 = vld [vmem:[#allocation5 + $0x790] sm:$0xff] }
  0xb4   :  { %v2343_v46 = vpack.c.bf16 %v233_v43, %v217_v42  ;;  %v176_v42 = vld [vmem:[#allocation5 + $0x218] sm:$0xff] }
  0xb5   :  { %v192_v43 = vld [vmem:[#allocation5 + $0x298] sm:$0xff] }
  0xb6   :  { %2272 = vmatpush1.bf16.msra.mxu0 %v2271_v48  ;;  %v249_v48 = vld [vmem:[#allocation5 + $0x460] sm:$0xff]  ;;  %v2177_v45 = vpack.c.bf16 %v192_v43, %v176_v42  ;;  %v116_v42 = vld [vmem:[#allocation5 + $0x38] sm:$0xff] }
  0xb7   :  { %2274 = vmatprep.subr.bf16.mxu0 %v2273_v49  ;;  %v265_v49 = vld [vmem:[#allocation5 + $0x4e0] sm:$0xff]  ;;  %v132_v43 = vld [vmem:[#allocation5 + $0xb8] sm:$0xff] }
  0xb8   :  { %v2347_v52 = vpack.c.bf16 %v265_v49, %v249_v48  ;;  %v208_v48 = vld [vmem:[#allocation5 + $0x318] sm:$0xff] }
  0xb9   :  { %v224_v49 = vld [vmem:[#allocation5 + $0x398] sm:$0xff] }
  0xba   :  { %2276 = vmatpush1.bf16.msra.mxu0 %v2275_v54  ;;  %v281_v54 = vld [vmem:[#allocation5 + $0x560] sm:$0xff]  ;;  %v2181_v51 = vpack.c.bf16 %v224_v49, %v208_v48  ;;  %v164_v48 = vld [vmem:[#allocation5 + $0x1b8] sm:$0xff] }
  0xbb   :  { %2278 = vmatprep.subr.bf16.mxu0 %v2277_v55  ;;  %v297_v55 = vld [vmem:[#allocation5 + $0x5e0] sm:$0xff] }
  0xbc   :  { %v2351_v59 = vpack.c.bf16 %v297_v55, %v281_v54  ;;  %v369_v55 = vlaneseq }
  0xbe   :  { %2280 = vmatpush1.bf16.msra.mxu0 %v2279_v61  ;;  %v313_v61 = vld [vmem:[#allocation5 + $0x660] sm:$0xff]  ;;  %v3055_v57 = vshrl.u32 %v369_v55, 7 }
  0xbf   :  { %2282 = vmatprep.subr.bf16.mxu0 %v2281_v62  ;;  %v329_v62 = vld [vmem:[#allocation5 + $0x6e0] sm:$0xff] }
  0xc0   :  { %v2355_v2 = vpack.c.bf16 %v329_v62, %v313_v61  ;;  %v371_v58 = vsub.s32 0, %v3055_v57 }
  0xc2   :  { %2284 = vmatpush1.bf16.msra.mxu0 %v2283_v4  ;;  %v345_v4 = vld [vmem:[#allocation5 + $0x760] sm:$0xff] }
  0xc3   :  { %2286 = vmatprep.subr.bf16.mxu0 %v2285_v5  ;;  %v361_v5 = vld [vmem:[#allocation5 + $0x7e0] sm:$0xff] }
  0xc4   :  { %v2359_v8 = vpack.c.bf16 %v361_v5, %v345_v4 }
  0xc6   :  { %2288 = vmatpush1.bf16.msra.mxu0 %v2287_v10  ;;  %v1017_v10 = vld [vmem:[#allocation8] sm:$0xff] }
  0xc7   :  { %2290 = vmatprep.subr.bf16.mxu0 %v2289_v11  ;;  %v1019_v11 = vld [vmem:[#allocation8 + $0x10] sm:$0xff] }
  0xc8   :  { %v3020_v14 = vpack.c.bf16 %v1019_v11, %v1017_v10  ;;  %v239_v11 = vld [vmem:[#allocation5 + $0x410] sm:$0xff] }
  0xc9   :  { %v2187_v13 = vpack.c.bf16 %v255_v12, %v239_v11 }
  0xca   :  { %2292 = vmatpush1.bf16.msra.mxu0 %v2291_v16  ;;  %v1021_v16 = vld [vmem:[#allocation8 + $0x20] sm:$0xff] }
  0xcb   :  { %2294 = vmatprep.subr.bf16.mxu0 %v2293_v17  ;;  %v1023_v17 = vld [vmem:[#allocation8 + $0x30] sm:$0xff] }
  0xcc   :  { %v3027_v20 = vpack.c.bf16 %v1023_v17, %v1021_v16  ;;  %v272_v16 = vld [vmem:[#allocation5 + $0x518] sm:$0xff] }
  0xcd   :  { %v288_v17 = vld [vmem:[#allocation5 + $0x598] sm:$0xff] }
  0xce   :  { %2296 = vmatpush1.bf16.msra.mxu0 %v2295_v22  ;;  %v1025_v22 = vld [vmem:[#allocation8 + $0x40] sm:$0xff]  ;;  %v2189_v19 = vpack.c.bf16 %v288_v17, %v272_v16  ;;  %v276_v17 = vld [vmem:[#allocation5 + $0x538] sm:$0xff] }
  0xcf   :  { %2330 = vmatprep.subr.bf16.mxu0 %v2329_v23  ;;  %v1027_v23 = vld [vmem:[#allocation8 + $0x50] sm:$0xff]  ;;  %v259_v16 = vld [vmem:[#allocation5 + $0x4b0] sm:$0xff] }
  0xd0   :  { %v3034_v26 = vpack.c.bf16 %v1027_v23, %v1025_v22  ;;  %v287_v22 = vld [vmem:[#allocation5 + $0x590] sm:$0xff]  ;;  %v304_v23 = vld [vmem:[#allocation5 + $0x618] sm:$0xff] }
  0xd1   :  { %798 = vmatmul.mubr.f32.vlgmr.msra.gmra.mrb[4].mxu0 %v3010_v56  ;;  %v2191_v25 = vpack.c.bf16 %v287_v22, %v271_v18  ;;  %v292_v18 = vld [vmem:[#allocation5 + $0x5b8] sm:$0xff] }
  0xd2   :  { %2332 = vmatpush1.bf16.msra.mxu0 %v2331_v28  ;;  %939 = vmatprep.mubr.f32.mxu0 %v2881_v0  ;;  %v1029_v28 = vld [vmem:[#allocation8 + $0x60] sm:$0xff]  ;;  %v2253_v22 = vpack.c.bf16 %v292_v18, %v276_v17  ;;  %v280_v17 = vld [vmem:[#allocation5 + $0x558] sm:$0xff] }
  0xd3   :  { %2334 = vmatprep.subr.bf16.mxu0 %v2333_v29  ;;  %v1031_v29 = vld [vmem:[#allocation8 + $0x70] sm:$0xff]  ;;  %v296_v18 = vld [vmem:[#allocation5 + $0x5d8] sm:$0xff] }
  0xd4   :  { %v3040_v30 = vpack.c.bf16 %v1031_v29, %v1029_v28  ;;  %v2193_v28 = vpack.c.bf16 %v320_v24, %v304_v23  ;;  %v303_v29 = vld [vmem:[#allocation5 + $0x610] sm:$0xff] }
  0xd5   :  { %v275_v23 = vld [vmem:[#allocation5 + $0x530] sm:$0xff] }
  0xd6   :  { %2336 = vmatpush1.bf16.msra.mxu0 %v2335_v34  ;;  %v2169_v34 = vpack.c.bf16 %v128_v32, %v112_v31  ;;  %v319_v31 = vld [vmem:[#allocation5 + $0x690] sm:$0xff]  ;;  %v336_v32 = vld [vmem:[#allocation5 + $0x718] sm:$0xff] }
  0xd7   :  { %2338 = vmatprep.subr.bf16.mxu0 %v2337_v35  ;;  %v127_v35 = vld [vmem:[#allocation5 + $0x90] sm:$0xff] }
  0xd8   :  { %v2171_v38 = vpack.c.bf16 %v127_v35, %v111_v33  ;;  %2170 = vmatprep.subr.bf16.mxu1 %v2169_v34  ;;  %v352_v33 = vld [vmem:[#allocation5 + $0x798] sm:$0xff]  ;;  %v2195_v34 = vpack.c.bf16 %v319_v31, %v303_v29  ;;  %v291_v24 = vld [vmem:[#allocation5 + $0x5b0] sm:$0xff] }
  0xd9   :  { %v2197_v35 = vpack.c.bf16 %v352_v33, %v336_v32  ;;  %v2255_v29 = vpack.c.bf16 %v291_v24, %v275_v23  ;;  %v307_v32 = vld [vmem:[#allocation5 + $0x630] sm:$0xff] }
  0xda   :  { %2340 = vmatpush1.bf16.msra.mxu0 %v2339_v40  ;;  %v143_v40 = vld [vmem:[#allocation5 + $0x110] sm:$0xff]  ;;  %2172 = vmatpush1.bf16.msra.mxu1 %v2171_v38 }
  0xdb   :  { %2342 = vmatprep.subr.bf16.mxu0 %v2341_v41  ;;  %v159_v41 = vld [vmem:[#allocation5 + $0x190] sm:$0xff]  ;;  %2174 = vmatprep.subr.bf16.mxu1 %v2173_v39 }
  0xdc   :  { %v2175_v44 = vpack.c.bf16 %v159_v41, %v143_v40  ;;  %v2199_v41 = vpack.c.bf16 %v351_v37, %v335_v36  ;;  %v323_v33 = vld [vmem:[#allocation5 + $0x6b0] sm:$0xff] }
  0xdd   :  { %v2259_v36 = vpack.c.bf16 %v323_v33, %v307_v32  ;;  %v279_v23 = vld [vmem:[#allocation5 + $0x550] sm:$0xff] }
  0xde   :  { %2344 = vmatpush1.bf16.msra.mxu0 %v2343_v46  ;;  %v175_v46 = vld [vmem:[#allocation5 + $0x210] sm:$0xff]  ;;  %2176 = vmatpush1.bf16.msra.mxu1 %v2175_v44 }
  0xdf   :  { %2346 = vmatprep.subr.bf16.mxu0 %v2345_v47  ;;  %v191_v47 = vld [vmem:[#allocation5 + $0x290] sm:$0xff]  ;;  %2178 = vmatprep.subr.bf16.mxu1 %v2177_v45  ;;  %v2233_v45 = vpack.c.bf16 %v132_v43, %v116_v42  ;;  %v136_v42 = vld [vmem:[#allocation5 + $0xd8] sm:$0xff] }
  0xe0   :  { %v2179_v50 = vpack.c.bf16 %v191_v47, %v175_v46  ;;  %v115_v44 = vld [vmem:[#allocation5 + $0x30] sm:$0xff]  ;;  %v148_v47 = vld [vmem:[#allocation5 + $0x138] sm:$0xff] }
  0xe1   :  { %v131_v46 = vld [vmem:[#allocation5 + $0xb0] sm:$0xff] }
  0xe2   :  { %2348 = vmatpush1.bf16.msra.mxu0 %v2347_v52  ;;  %v207_v52 = vld [vmem:[#allocation5 + $0x310] sm:$0xff]  ;;  %2180 = vmatpush1.bf16.msra.mxu1 %v2179_v50  ;;  %v2235_v49 = vpack.c.bf16 %v131_v46, %v115_v44  ;;  %v2237_v50 = vpack.c.bf16 %v164_v48, %v148_v47  ;;  %v152_v47 = vld [vmem:[#allocation5 + $0x158] sm:$0xff] }
  0xe3   :  { %2350 = vmatprep.subr.bf16.mxu0 %v2349_v53  ;;  %v223_v53 = vld [vmem:[#allocation5 + $0x390] sm:$0xff]  ;;  %2182 = vmatprep.subr.bf16.mxu1 %v2181_v51  ;;  %v168_v48 = vld [vmem:[#allocation5 + $0x1d8] sm:$0xff] }
  0xe4   :  { %v2183_v54 = vpack.c.bf16 %v223_v53, %v207_v52  ;;  %v147_v51 = vld [vmem:[#allocation5 + $0x130] sm:$0xff]  ;;  %v180_v53 = vld [vmem:[#allocation5 + $0x238] sm:$0xff] }
  0xe5   :  { %v163_v52 = vld [vmem:[#allocation5 + $0x1b0] sm:$0xff] }
  0xe6   :  { %2352 = vmatpush1.bf16.msra.mxu0 %v2351_v59  ;;  %2184 = vmatpush1.bf16.msra.mxu1 %v2183_v54  ;;  %v3058_v59 = vld [vmem:[#allocation7] sm:$0xff]  ;;  %v196_v54 = vld [vmem:[#allocation5 + $0x2b8] sm:$0xff]  ;;  %v2239_v55 = vpack.c.bf16 %v163_v52, %v147_v51  ;;  %v135_v46 = vld [vmem:[#allocation5 + $0xd0] sm:$0xff] }
  0xe7   :  { %2354 = vmatprep.subr.bf16.mxu0 %v2353_v60  ;;  %v372_v60 = vrot.slane %v3058_v59, %v371_v58  ;;  %v151_v51 = vld [vmem:[#allocation5 + $0x150] sm:$0xff] }
  0xe8   :  { %v167_v52 = vld [vmem:[#allocation5 + $0x1d0] sm:$0xff] }
  0xe9   :  { %v295_v24 = vld [vmem:[#allocation5 + $0x5d0] sm:$0xff] }
  0xea   :  { %2356 = vmatpush1.bf16.msra.mxu0 %v2355_v2  ;;  %v375_v2 = vsub.s32 1, %v3055_v57  ;;  %v311_v32 = vld [vmem:[#allocation5 + $0x650] sm:$0xff] }
  0xeb   :  { %2358 = vmatprep.subr.bf16.mxu0 %v2357_v3  ;;  %v327_v33 = vld [vmem:[#allocation5 + $0x6d0] sm:$0xff] }
  0xec   :  { %v376_v3 = vrot.slane %v3058_v59, %v375_v2 }
  0xee   :  { %2360 = vmatpush1.bf16.msra.mxu0 %v2359_v8  ;;  %v256_v8 = vld [vmem:[#allocation5 + $0x498] sm:$0xff] }
  0xef   :  { %2394 = vmatprep.subr.bf16.mxu0 %v3018_v9  ;;  %v2185_v10 = vpack.c.bf16 %v256_v8, %v240_v7  ;;  %v227_v7 = vld [vmem:[#allocation5 + $0x3b0] sm:$0xff]  ;;  %v244_v8 = vld [vmem:[#allocation5 + $0x438] sm:$0xff] }
  0xf1   :  { %940 = vmatmul.mubr.f32.vlgmr.msra.gmra.mrb[6].mxu0 %v3010_v56  ;;  %2186 = vmatprep.subr.bf16.mxu1 %v2185_v10  ;;  %v260_v10 = vld [vmem:[#allocation5 + $0x4b8] sm:$0xff] }
  0xf2   :  { %2396 = vmatpush1.bf16.msra.mxu0 %v3020_v14  ;;  %1101 = vmatprep.mubr.f32.mxu0 %v2881_v0  ;;  %v2249_v12 = vpack.c.bf16 %v260_v10, %v244_v8  ;;  %v248_v8 = vld [vmem:[#allocation5 + $0x458] sm:$0xff] }
  0xf3   :  { %2398 = vmatprep.subr.bf16.mxu0 %v3023_v15  ;;  %2188 = vmatpush1.bf16.msra.mxu1 %v2187_v13  ;;  %v243_v13 = vld [vmem:[#allocation5 + $0x430] sm:$0xff]  ;;  %v264_v10 = vld [vmem:[#allocation5 + $0x4d8] sm:$0xff] }
  0xf4   :  { %2190 = vmatprep.subr.bf16.mxu1 %v2189_v19  ;;  %v2251_v19 = vpack.c.bf16 %v259_v16, %v243_v13  ;;  %v247_v13 = vld [vmem:[#allocation5 + $0x450] sm:$0xff] }
  0xf5   :  { %v263_v16 = vld [vmem:[#allocation5 + $0x4d0] sm:$0xff] }
  0xf6   :  { %2400 = vmatpush1.bf16.msra.mxu0 %v3027_v20 }
  0xf7   :  { %2402 = vmatprep.subr.bf16.mxu0 %v3031_v21  ;;  %2192 = vmatpush1.bf16.msra.mxu1 %v2191_v25  ;;  %v308_v25 = vld [vmem:[#allocation5 + $0x638] sm:$0xff] }
  0xf8   :  { %2194 = vmatprep.subr.bf16.mxu1 %v2193_v28  ;;  %v324_v28 = vld [vmem:[#allocation5 + $0x6b8] sm:$0xff] }
  0xf9   :  { %v2257_v31 = vpack.c.bf16 %v324_v28, %v308_v25  ;;  %v312_v25 = vld [vmem:[#allocation5 + $0x658] sm:$0xff] }
  0xfa   :  { %2404 = vmatpush1.bf16.msra.mxu0 %v3034_v26  ;;  %v328_v28 = vld [vmem:[#allocation5 + $0x6d8] sm:$0xff] }
  0xfb   :  { %2406 = vmatprep.subr.bf16.mxu0 %v3037_v27  ;;  %2196 = vmatpush1.bf16.msra.mxu1 %v2195_v34  ;;  %v340_v34 = vld [vmem:[#allocation5 + $0x738] sm:$0xff] }
  0xfc   :  { %2198 = vmatprep.subr.bf16.mxu1 %v2197_v35  ;;  %v356_v35 = vld [vmem:[#allocation5 + $0x7b8] sm:$0xff] }
  0xfd   :  { %v2261_v37 = vpack.c.bf16 %v356_v35, %v340_v34  ;;  %v344_v34 = vld [vmem:[#allocation5 + $0x758] sm:$0xff] }
  0xfe   :  { %2408 = vmatpush1.bf16.msra.mxu0 %v3040_v30  ;;  %v360_v35 = vld [vmem:[#allocation5 + $0x7d8] sm:$0xff] }
  0xff   :  { %2426 = vmatprep.subr.bf16.mxu0 %v3018_v9  ;;  %2200 = vmatpush1.bf16.msra.mxu1 %v2199_v41  ;;  %v120_v41 = vld [vmem:[#allocation5 + $0x58] sm:$0xff] }
 0x100   :  { %2234 = vmatprep.subr.bf16.mxu1 %v2233_v45  ;;  %v2297_v44 = vpack.c.bf16 %v136_v42, %v120_v41  ;;  %v119_v45 = vld [vmem:[#allocation5 + $0x50] sm:$0xff]  ;;  %v124_v41 = vld [vmem:[#allocation5 + $0x78] sm:$0xff] }
 0x101   :  { %1102 = vmatmul.mubr.f32.vlgmr.msra.gmra.mrb[0].mxu0 %v2881_v0  ;;  %v140_v42 = vld [vmem:[#allocation5 + $0xf8] sm:$0xff] }
 0x102   :  { %2428 = vmatpush1.bf16.msra.mxu0 %v3020_v14  ;;  %1297 = vmatprep.mubr.f32.mxu0 %v2881_v0 }
 0x103   :  { %2430 = vmatprep.subr.bf16.mxu0 %v3023_v15  ;;  %585 = vmatmul.mubr.f32.vlgmr.msra.gmra.mrb[0].mxu1 %v3010_v56 }
 0x104   :  { %2236 = vmatpush1.bf16.msra.mxu1 %v2235_v49  ;;  %726 = vmatprep.mubr.f32.mxu1 %v2881_v0  ;;  %v2299_v49 = vpack.c.bf16 %v135_v46, %v119_v45  ;;  %v123_v45 = vld [vmem:[#allocation5 + $0x70] sm:$0xff] }
 0x105   :  { %2238 = vmatprep.subr.bf16.mxu1 %v2237_v50  ;;  %v2301_v50 = vpack.c.bf16 %v168_v48, %v152_v47  ;;  %v139_v46 = vld [vmem:[#allocation5 + $0xf0] sm:$0xff]  ;;  %v156_v47 = vld [vmem:[#allocation5 + $0x178] sm:$0xff] }
 0x106   :  { %2432 = vmatpush1.bf16.msra.mxu0 %v3027_v20  ;;  %v172_v48 = vld [vmem:[#allocation5 + $0x1f8] sm:$0xff] }
 0x107   :  { %2434 = vmatprep.subr.bf16.mxu0 %v3031_v21 }
 0x108   :  { %2240 = vmatpush1.bf16.msra.mxu1 %v2239_v55  ;;  %v2303_v55 = vpack.c.bf16 %v167_v52, %v151_v51  ;;  %v155_v51 = vld [vmem:[#allocation5 + $0x170] sm:$0xff] }
 0x109   :  { %v171_v52 = vld [vmem:[#allocation5 + $0x1f0] sm:$0xff] }
 0x10a   :  { %2436 = vmatpush1.bf16.msra.mxu0 %v3034_v26 }
 0x10b   :  { %2438 = vmatprep.subr.bf16.mxu0 %v3037_v27 }
 0x10e   :  { %2440 = vmatpush1.bf16.msra.mxu0 %v3040_v30 }
 0x10f   :  { %2458 = vmatprep.subr.bf16.mxu0 %v3018_v9 }
 0x1d4   :  { %v1103_v61 = vpop.f32.mrb[0].mxu0 }
 0x1d5   :  { %v2557_v62 = vadd.f32 %v1103_v61, %v372_v60  ;;  %v1105_v63 = vpop.f32.mrb[1].mxu0  ;;  %v2241_v60 = vpack.c.bf16 %v196_v54, %v180_v53  ;;  %v179_v61 = vld [vmem:[#allocation5 + $0x230] sm:$0xff]  ;;  %v184_v53 = vld [vmem:[#allocation5 + $0x258] sm:$0xff] }
 0x1d6   :  { %v3067_v4 = vadd.f32 %v1105_v63, %v376_v3  ;;  %v212_v63 = vld [vmem:[#allocation5 + $0x338] sm:$0xff] }
 0x1d7   :  { %v2030_v1 = vmul.f32 -1.442695, %v2557_v62  ;;  %v195_v62 = vld [vmem:[#allocation5 + $0x2b0] sm:$0xff]  ;;  %2242 = vmatprep.subr.bf16.mxu1 %v2241_v60  ;;  %v200_v54 = vld [vmem:[#allocation5 + $0x2d8] sm:$0xff] }
 0x1d8   :  { %v2243_v3 = vpack.c.bf16 %v195_v62, %v179_v61  ;;  %v2305_v60 = vpack.c.bf16 %v200_v54, %v184_v53  ;;  %v183_v61 = vld [vmem:[#allocation5 + $0x250] sm:$0xff]  ;;  %v188_v53 = vld [vmem:[#allocation5 + $0x278] sm:$0xff] }
 0x1d9   :  { %2605 = vpow2.f32 %v2030_v1  ;;  %v228_v1 = vld [vmem:[#allocation5 + $0x3b8] sm:$0xff]  ;;  %v199_v62 = vld [vmem:[#allocation5 + $0x2d0] sm:$0xff] }
 0x1da   :  { %2607 = vtanh.f32 %v3067_v4  ;;  %2244 = vmatpush1.bf16.msra.mxu1 %v2243_v3  ;;  %v2307_v3 = vpack.c.bf16 %v199_v62, %v183_v61  ;;  %v204_v54 = vld [vmem:[#allocation5 + $0x2f8] sm:$0xff]  ;;  %v187_v61 = vld [vmem:[#allocation5 + $0x270] sm:$0xff] }
 0x1db   :  { %v203_v62 = vld [vmem:[#allocation5 + $0x2f0] sm:$0xff] }
 0x1e3   :  { %v2606_v5 = vpop.eup %2605 }
 0x1e4   :  { %v1114_v6 = vadd.f32 1.0, %v2606_v5  ;;  %v2608_v38 = vpop.eup %2607  ;;  %v2245_v5 = vpack.c.bf16 %v228_v1, %v212_v63  ;;  %v216_v63 = vld [vmem:[#allocation5 + $0x358] sm:$0xff] }
 0x1e5   :  { %v232_v1 = vld [vmem:[#allocation5 + $0x3d8] sm:$0xff] }
 0x1e6   :  { %2609 = vrcp.f32 %v1114_v6  ;;  %v211_v6 = vld [vmem:[#allocation5 + $0x330] sm:$0xff]  ;;  %2246 = vmatprep.subr.bf16.mxu1 %v2245_v5  ;;  %v2309_v5 = vpack.c.bf16 %v232_v1, %v216_v63  ;;  %v220_v63 = vld [vmem:[#allocation5 + $0x378] sm:$0xff] }
 0x1e7   :  { %v2247_v11 = vpack.c.bf16 %v227_v7, %v211_v6  ;;  %v215_v6 = vld [vmem:[#allocation5 + $0x350] sm:$0xff]  ;;  %v236_v1 = vld [vmem:[#allocation5 + $0x3f8] sm:$0xff] }
 0x1e8   :  { %v231_v7 = vld [vmem:[#allocation5 + $0x3d0] sm:$0xff] }
 0x1e9   :  { %2248 = vmatpush1.bf16.msra.mxu1 %v2247_v11  ;;  %v2311_v11 = vpack.c.bf16 %v231_v7, %v215_v6  ;;  %v219_v6 = vld [vmem:[#allocation5 + $0x370] sm:$0xff] }
 0x1ea   :  { %2250 = vmatprep.subr.bf16.mxu1 %v2249_v12  ;;  %v2313_v12 = vpack.c.bf16 %v264_v10, %v248_v8  ;;  %v235_v7 = vld [vmem:[#allocation5 + $0x3f0] sm:$0xff]  ;;  %v252_v8 = vld [vmem:[#allocation5 + $0x478] sm:$0xff] }
 0x1eb   :  { %v268_v10 = vld [vmem:[#allocation5 + $0x4f8] sm:$0xff] }
 0x1ed   :  { %2252 = vmatpush1.bf16.msra.mxu1 %v2251_v19  ;;  %v2315_v19 = vpack.c.bf16 %v263_v16, %v247_v13  ;;  %v267_v13 = vld [vmem:[#allocation5 + $0x4f0] sm:$0xff]  ;;  %v284_v16 = vld [vmem:[#allocation5 + $0x578] sm:$0xff] }
 0x1ee   :  { %2254 = vmatprep.subr.bf16.mxu1 %v2253_v22  ;;  %v2317_v22 = vpack.c.bf16 %v296_v18, %v280_v17  ;;  %v300_v17 = vld [vmem:[#allocation5 + $0x5f8] sm:$0xff] }
 0x1f0   :  { %v3070_v39 = vpop.eup %2609 }
 0x1f1   :  { %v1122_v40 = vmul.f32 %v3070_v39, %v2608_v38  ;;  %2256 = vmatpush1.bf16.msra.mxu1 %v2255_v29  ;;  %v339_v38 = vld [vmem:[#allocation5 + $0x730] sm:$0xff]  ;;  %v2319_v29 = vpack.c.bf16 %v295_v24, %v279_v23  ;;  %v316_v24 = vld [vmem:[#allocation5 + $0x678] sm:$0xff] }
 0x1f2   :  { %2258 = vmatprep.subr.bf16.mxu1 %v2257_v31  ;;  %v2321_v31 = vpack.c.bf16 %v328_v28, %v312_v25  ;;  %v299_v23 = vld [vmem:[#allocation5 + $0x5f0] sm:$0xff]  ;;  %v332_v25 = vld [vmem:[#allocation5 + $0x6f8] sm:$0xff] }
 0x1f3   :  { %1124 = vrot.lane.b32.xlu0 %v1122_v40, %s2882_s6  ;;  %v355_v40 = vld [vmem:[#allocation5 + $0x7b0] sm:$0xff] }
 0x1f4   :  { %v2263_v43 = vpack.c.bf16 %v355_v40, %v339_v38  ;;  %v343_v38 = vld [vmem:[#allocation5 + $0x750] sm:$0xff] }
 0x1f5   :  { %2260 = vmatpush1.bf16.msra.mxu1 %v2259_v36  ;;  %v2323_v36 = vpack.c.bf16 %v327_v33, %v311_v32  ;;  %v359_v40 = vld [vmem:[#allocation5 + $0x7d0] sm:$0xff]  ;;  %v348_v33 = vld [vmem:[#allocation5 + $0x778] sm:$0xff] }
 0x1f6   :  { %2262 = vmatprep.subr.bf16.mxu1 %v2261_v37  ;;  %v2325_v37 = vpack.c.bf16 %v360_v35, %v344_v34  ;;  %v331_v32 = vld [vmem:[#allocation5 + $0x6f0] sm:$0xff]  ;;  %v364_v34 = vld [vmem:[#allocation5 + $0x7f8] sm:$0xff] }
 0x1f9   :  { %2264 = vmatpush1.bf16.msra.mxu1 %v2263_v43  ;;  %v2327_v43 = vpack.c.bf16 %v359_v40, %v343_v38  ;;  %v363_v38 = vld [vmem:[#allocation5 + $0x7f0] sm:$0xff] }
 0x1fa   :  { %2298 = vmatprep.subr.bf16.mxu1 %v2297_v44  ;;  %v2361_v44 = vpack.c.bf16 %v140_v42, %v124_v41  ;;  %v2031_v41 = vmul.f32 -1.442695, %v3067_v4  ;;  %v2705_v42 = vld [vmem:[#allocation2] sm:$0xff] }
 0x1fc   :  { %727 = vmatmul.mubr.f32.vlgmr.msra.gmra.mrb[2].mxu1 %v3010_v56  ;;  %2611 = vpow2.f32 %v2031_v41 }
 0x1fd   :  { %2300 = vmatpush1.bf16.msra.mxu1 %v2299_v49  ;;  %868 = vmatprep.mubr.f32.mxu1 %v2881_v0  ;;  %v2363_v49 = vpack.c.bf16 %v139_v46, %v123_v45 }
 0x1fe   :  { %2302 = vmatprep.subr.bf16.mxu1 %v2301_v50  ;;  %v2365_v50 = vpack.c.bf16 %v172_v48, %v156_v47 }
 0x201   :  { %2304 = vmatpush1.bf16.msra.mxu1 %v2303_v55  ;;  %v2367_v55 = vpack.c.bf16 %v171_v52, %v155_v51 }
 0x202   :  { %2306 = vmatprep.subr.bf16.mxu1 %v2305_v60  ;;  %v2369_v60 = vpack.c.bf16 %v204_v54, %v188_v53 }
 0x205   :  { %2308 = vmatpush1.bf16.msra.mxu1 %v2307_v3  ;;  %v2371_v3 = vpack.c.bf16 %v203_v62, %v187_v61 }
 0x206   :  { %2310 = vmatprep.subr.bf16.mxu1 %v2309_v5  ;;  %v2373_v5 = vpack.c.bf16 %v236_v1, %v220_v63 }
 0x209   :  { %2312 = vmatpush1.bf16.msra.mxu1 %v2311_v11  ;;  %v2377_v11 = vpack.c.bf16 %v268_v10, %v252_v8 }
 0x20a   :  { %2314 = vmatprep.subr.bf16.mxu1 %v2313_v12  ;;  %v251_v12 = vld [vmem:[#allocation5 + $0x470] sm:$0xff] }
 0x20b   :  { %v2379_v18 = vpack.c.bf16 %v267_v13, %v251_v12 }
 0x20d   :  { %2316 = vmatpush1.bf16.msra.mxu1 %v2315_v19  ;;  %v2381_v19 = vpack.c.bf16 %v300_v17, %v284_v16 }
 0x20e   :  { %2318 = vmatprep.subr.bf16.mxu1 %v2317_v22  ;;  %v283_v22 = vld [vmem:[#allocation5 + $0x570] sm:$0xff] }
 0x20f   :  { %v2383_v28 = vpack.c.bf16 %v299_v23, %v283_v22 }
 0x211   :  { %2320 = vmatpush1.bf16.msra.mxu1 %v2319_v29  ;;  %v2385_v29 = vpack.c.bf16 %v332_v25, %v316_v24 }
 0x212   :  { %2322 = vmatprep.subr.bf16.mxu1 %v2321_v31  ;;  %v315_v31 = vld [vmem:[#allocation5 + $0x670] sm:$0xff] }
 0x213   :  { %v2387_v35 = vpack.c.bf16 %v331_v32, %v315_v31 }
 0x215   :  { %2324 = vmatpush1.bf16.msra.mxu1 %v2323_v36  ;;  %v2389_v36 = vpack.c.bf16 %v364_v34, %v348_v33 }
 0x216   :  { %2326 = vmatprep.subr.bf16.mxu1 %v2325_v37  ;;  %v347_v37 = vld [vmem:[#allocation5 + $0x770] sm:$0xff] }
 0x217   :  { %v2391_v40 = vpack.c.bf16 %v363_v38, %v347_v37 }
 0x219   :  { %2328 = vmatpush1.bf16.msra.mxu1 %v2327_v43  ;;  %v2612_v43 = vpop.eup %2611 }
 0x21a   :  { %2362 = vmatprep.subr.bf16.mxu1 %v2361_v44  ;;  %v1115_v4 = vadd.f32 1.0, %v2612_v43  ;;  %v1121_v44 = vmul.f32 0.0, %v3070_v39  ;;  %v379_v39 = vsub.s32 2, %v3055_v57 }
 0x21c   :  { %869 = vmatmul.mubr.f32.vlgmr.msra.gmra.mrb[4].mxu1 %v3010_v56  ;;  %v2375_v56 = vpack.c.bf16 %v235_v7, %v219_v6  ;;  %2613 = vrcp.f32 %v1115_v4  ;;  %v380_v51 = vrot.slane %v3058_v59, %v379_v39 }
 0x21d   :  { %2364 = vmatpush1.bf16.msra.mxu1 %v2363_v49  ;;  %1010 = vmatprep.mubr.f32.mxu1 %v2881_v0 }
 0x21e   :  { %2366 = vmatprep.subr.bf16.mxu1 %v2365_v50 }
 0x221   :  { %2368 = vmatpush1.bf16.msra.mxu1 %v2367_v55 }
 0x222   :  { %2370 = vmatprep.subr.bf16.mxu1 %v2369_v60  ;;  %v383_v60 = vsub.s32 3, %v3055_v57 }
 0x224   :  { %v384_v61 = vrot.slane %v3058_v59, %v383_v60 }
 0x225   :  { %2372 = vmatpush1.bf16.msra.mxu1 %v2371_v3 }
 0x226   :  { %2374 = vmatprep.subr.bf16.mxu1 %v2373_v5  ;;  %v2614_v47 = vpop.eup %2613 }
 0x229   :  { %2376 = vmatpush1.bf16.msra.mxu1 %v2375_v56 }
 0x22a   :  { %2378 = vmatprep.subr.bf16.mxu1 %v2377_v11 }
 0x22d   :  { %2380 = vmatpush1.bf16.msra.mxu1 %v2379_v18 }
 0x22e   :  { %2382 = vmatprep.subr.bf16.mxu1 %v2381_v19  ;;  %v387_v19 = vsub.s32 4, %v3055_v57 }
 0x230   :  { %v388_v22 = vrot.slane %v3058_v59, %v387_v19 }
 0x231   :  { %2384 = vmatpush1.bf16.msra.mxu1 %v2383_v28 }
 0x232   :  { %2386 = vmatprep.subr.bf16.mxu1 %v2385_v29  ;;  %v391_v29 = vsub.s32 5, %v3055_v57 }
 0x234   :  { %v392_v31 = vrot.slane %v3058_v59, %v391_v29 }
 0x235   :  { %2388 = vmatpush1.bf16.msra.mxu1 %v2387_v35 }
 0x236   :  { %2390 = vmatprep.subr.bf16.mxu1 %v2389_v36 }
 0x239   :  { %2392 = vmatpush1.bf16.msra.mxu1 %v2391_v40 }
 0x23a   :  { %2410 = vmatprep.subr.bf16.mxu1 %v3018_v9 }
 0x23c   :  { %1011 = vmatmul.mubr.f32.vlgmr.msra.gmra.mrb[6].mxu1 %v2705_v42 }
 0x23d   :  { %2412 = vmatpush1.bf16.msra.mxu1 %v3020_v14  ;;  %1199 = vmatprep.mubr.f32.mxu1 %v2881_v0 }
 0x23e   :  { %2414 = vmatprep.subr.bf16.mxu1 %v3023_v15 }
 0x241   :  { %2416 = vmatpush1.bf16.msra.mxu1 %v3027_v20 }
 0x242   :  { %2418 = vmatprep.subr.bf16.mxu1 %v3031_v21 }
 0x245   :  { %2420 = vmatpush1.bf16.msra.mxu1 %v3034_v26 }
 0x246   :  { %2422 = vmatprep.subr.bf16.mxu1 %v3037_v27 }
 0x249   :  { %2424 = vmatpush1.bf16.msra.mxu1 %v3040_v30 }
 0x24a   :  { %2442 = vmatprep.subr.bf16.mxu1 %v3018_v9 }
 0x265   :  { %v1125_v45 = vpop.permute.xlu0 %1124 }
 0x266   :  { %v1127_v46 = vadd.f32 %v1125_v45, %v1121_v44 }
 0x268   :  { %2615 = vtanh.f32 %v1127_v46 }
 0x272   :  { %v2616_v48 = vpop.eup %2615 }
 0x273   :  { %v1129_v49 = vmul.f32 %v2616_v48, %v2614_v47  ;;  %v395_v48 = vsub.s32 6, %v3055_v57 }
 0x275   :  { %1131 = vrot.lane.b32.xlu0 %v1129_v49, %s2882_s6  ;;  %v396_v49 = vrot.slane %v3058_v59, %v395_v48 }
 0x2e7   :  { %v1132_v50 = vpop.permute.xlu0 %1131 }
 0x2e8   :  { %2032 = vmatmul.mubr.msk.f32.vlgmr.msra.gmra.mrb[0].mxu1 %vm1033_vm0, %v1132_v50 }
 0x2e9   :  { %2444 = vmatpush1.bf16.msra.mxu1 %v3020_v14  ;;  %1395 = vmatprep.mubr.f32.mxu1 %v2881_v0 }
 0x2ea   :  { %2446 = vmatprep.subr.bf16.mxu1 %v3023_v15 }
 0x2ed   :  { %2448 = vmatpush1.bf16.msra.mxu1 %v3027_v20 }
 0x2ee   :  { %2450 = vmatprep.subr.bf16.mxu1 %v3031_v21 }
 0x2f1   :  { %2452 = vmatpush1.bf16.msra.mxu1 %v3034_v26 }
 0x2f2   :  { %2454 = vmatprep.subr.bf16.mxu1 %v3037_v27 }
 0x2f5   :  { %2456 = vmatpush1.bf16.msra.mxu1 %v3040_v30 }
 0x2f6   :  { %2474 = vmatprep.subr.bf16.mxu1 %v3018_v9 }
 0x3bb   :  { %v1201_v52 = vpop.f32.mrb[0].mxu1 }
 0x3bc   :  { %v2559_v53 = vadd.f32 %v1201_v52, %v380_v51  ;;  %v1203_v54 = vpop.f32.mrb[1].mxu1 }
 0x3bd   :  { %v2560_v62 = vadd.f32 %v1203_v54, %v384_v61  ;;  %v399_v54 = vsub.s32 7, %v3055_v57  ;;  %v1822_v57 = vld [vmem:[#allocation10 + $0x18] sm:$0xff] }
 0x3be   :  { %v2033_v55 = vmul.f32 -1.442695, %v2559_v53 }
 0x3bf   :  { %v2034_v7 = vmul.f32 -1.442695, %v2560_v62 }
 0x3c0   :  { %2617 = vpow2.f32 %v2033_v55  ;;  %v400_v55 = vrot.slane %v3058_v59, %v399_v54 }
 0x3c1   :  { %2619 = vtanh.f32 %v2560_v62 }
 0x3ca   :  { %v2618_v63 = vpop.eup %2617 }
 0x3cb   :  { %v1212_v1 = vadd.f32 1.0, %v2618_v63  ;;  %v2620_v3 = vpop.eup %2619 }
 0x3cd   :  { %2621 = vrcp.f32 %v1212_v1 }
 0x3ce   :  { %2623 = vpow2.f32 %v2034_v7 }
 0x3d7   :  { %v2622_v5 = vpop.eup %2621 }
 0x3d8   :  { %v1220_v6 = vmul.f32 %v2622_v5, %v2620_v3  ;;  %v2624_v8 = vpop.eup %2623  ;;  %v1219_v56 = vmul.f32 %v2622_v5, %v1127_v46 }
 0x3d9   :  { %v1213_v10 = vadd.f32 1.0, %v2624_v8 }
 0x3da   :  { %1222 = vrot.lane.b32.xlu1 %v1220_v6, %s2882_s6 }
 0x3db   :  { %2625 = vrcp.f32 %v1213_v10 }
 0x3e5   :  { %v2626_v13 = vpop.eup %2625 }
 0x44c   :  { %v1223_v11 = vpop.permute.xlu1 %1222 }
 0x44d   :  { %v1225_v12 = vadd.f32 %v1223_v11, %v1219_v56 }
 0x44f   :  { %2627 = vtanh.f32 %v1225_v12 }
 0x459   :  { %v2628_v16 = vpop.eup %2627 }
 0x45a   :  { %v1227_v17 = vmul.f32 %v2628_v16, %v2626_v13  ;;  %v3162_v16 = vld [vmem:[#allocation7 + $0x8] sm:$0xff] }
 0x45c   :  { %1229 = vrot.lane.b32.xlu1 %v1227_v17, %s2882_s6  ;;  %v404_v17 = vrot.slane %v3162_v16, %v371_v58 }
 0x4ce   :  { %v1230_v18 = vpop.permute.xlu1 %1229 }
 0x4cf   :  { %2035 = vmatmul.mubr.msk.f32.vlgmr.msra.gmra.mrb[2].mxu0 %vm1033_vm0, %v1230_v18 }
 0x4d0   :  { %2460 = vmatpush1.bf16.msra.mxu0 %v3020_v14  ;;  %1493 = vmatprep.mubr.f32.mxu0 %v2881_v0 }
 0x4d1   :  { %2462 = vmatprep.subr.bf16.mxu0 %v3023_v15 }
 0x4d4   :  { %2464 = vmatpush1.bf16.msra.mxu0 %v3027_v20 }
 0x4d5   :  { %2466 = vmatprep.subr.bf16.mxu0 %v3031_v21 }
 0x4d8   :  { %2468 = vmatpush1.bf16.msra.mxu0 %v3034_v26 }
 0x4d9   :  { %2470 = vmatprep.subr.bf16.mxu0 %v3037_v27 }
 0x4dc   :  { %2472 = vmatpush1.bf16.msra.mxu0 %v3040_v30 }
 0x4dd   :  { %2490 = vmatprep.subr.bf16.mxu0 %v3018_v9 }
 0x5a2   :  { %v1299_v23 = vpop.f32.mrb[2].mxu0 }
 0x5a3   :  { %v2561_v24 = vadd.f32 %v1299_v23, %v388_v22  ;;  %v1301_v25 = vpop.f32.mrb[3].mxu0 }
 0x5a4   :  { %v2562_v32 = vadd.f32 %v1301_v25, %v392_v31  ;;  %v408_v25 = vrot.slane %v3162_v16, %v375_v2 }
 0x5a5   :  { %v2036_v28 = vmul.f32 -1.442695, %v2561_v24 }
 0x5a6   :  { %v2037_v38 = vmul.f32 -1.442695, %v2562_v32 }
 0x5a7   :  { %2629 = vpow2.f32 %v2036_v28 }
 0x5a8   :  { %2631 = vtanh.f32 %v2562_v32 }
 0x5b1   :  { %v2630_v33 = vpop.eup %2629 }
 0x5b2   :  { %v1310_v34 = vadd.f32 1.0, %v2630_v33  ;;  %v2632_v35 = vpop.eup %2631 }
 0x5b4   :  { %2633 = vrcp.f32 %v1310_v34 }
 0x5b5   :  { %2635 = vpow2.f32 %v2037_v38 }
 0x5be   :  { %v2634_v36 = vpop.eup %2633 }
 0x5bf   :  { %v1318_v37 = vmul.f32 %v2634_v36, %v2632_v35  ;;  %v2636_v40 = vpop.eup %2635  ;;  %v1317_v42 = vmul.f32 %v2634_v36, %v1225_v12 }
 0x5c0   :  { %v1311_v41 = vadd.f32 1.0, %v2636_v40 }
 0x5c1   :  { %1320 = vrot.lane.b32.xlu0 %v1318_v37, %s2882_s6 }
 0x5c2   :  { %2637 = vrcp.f32 %v1311_v41 }
 0x5cc   :  { %v2638_v44 = vpop.eup %2637 }
 0x633   :  { %v1321_v43 = vpop.permute.xlu0 %1320 }
 0x634   :  { %v1323_v4 = vadd.f32 %v1321_v43, %v1317_v42 }
 0x636   :  { %2639 = vtanh.f32 %v1323_v4 }
 0x640   :  { %v2640_v45 = vpop.eup %2639 }
 0x641   :  { %v1325_v46 = vmul.f32 %v2640_v45, %v2638_v44  ;;  %v412_v44 = vrot.slane %v3162_v16, %v379_v39 }
 0x643   :  { %1327 = vrot.lane.b32.xlu1 %v1325_v46, %s2882_s6 }
 0x6b5   :  { %v1328_v47 = vpop.permute.xlu1 %1327 }
 0x6b6   :  { %2038 = vmatmul.mubr.msk.f32.vlgmr.msra.gmra.mrb[2].mxu1 %vm1033_vm0, %v1328_v47 }
 0x6b7   :  { %2476 = vmatpush1.bf16.msra.mxu1 %v3020_v14  ;;  %1591 = vmatprep.mubr.f32.mxu1 %v2881_v0 }
 0x6b8   :  { %2478 = vmatprep.subr.bf16.mxu1 %v3023_v15 }
 0x6bb   :  { %2480 = vmatpush1.bf16.msra.mxu1 %v3027_v20 }
 0x6bc   :  { %2482 = vmatprep.subr.bf16.mxu1 %v3031_v21 }
 0x6bf   :  { %2484 = vmatpush1.bf16.msra.mxu1 %v3034_v26 }
 0x6c0   :  { %2486 = vmatprep.subr.bf16.mxu1 %v3037_v27 }
 0x6c3   :  { %2488 = vmatpush1.bf16.msra.mxu1 %v3040_v30 }
 0x6c4   :  { %2506 = vmatprep.subr.bf16.mxu1 %v3018_v9 }
 0x789   :  { %v1397_v50 = vpop.f32.mrb[2].mxu1 }
 0x78a   :  { %v2563_v51 = vadd.f32 %v1397_v50, %v396_v49  ;;  %v1399_v52 = vpop.f32.mrb[3].mxu1 }
 0x78b   :  { %v2564_v61 = vadd.f32 %v1399_v52, %v400_v55 }
 0x78c   :  { %v2039_v53 = vmul.f32 -1.442695, %v2563_v51 }
 0x78d   :  { %v2040_v5 = vmul.f32 -1.442695, %v2564_v61 }
 0x78e   :  { %2641 = vpow2.f32 %v2039_v53 }
 0x78f   :  { %2643 = vtanh.f32 %v2564_v61 }
 0x798   :  { %v2642_v62 = vpop.eup %2641 }
 0x799   :  { %v1408_v9 = vadd.f32 1.0, %v2642_v62  ;;  %v2644_v63 = vpop.eup %2643 }
 0x79b   :  { %2645 = vrcp.f32 %v1408_v9 }
 0x79c   :  { %2647 = vpow2.f32 %v2040_v5 }
 0x7a5   :  { %v2646_v1 = vpop.eup %2645 }
 0x7a6   :  { %v1416_v3 = vmul.f32 %v2646_v1, %v2644_v63  ;;  %v2648_v6 = vpop.eup %2647  ;;  %v1415_v8 = vmul.f32 %v2646_v1, %v1323_v4  ;;  %v420_v63 = vrot.slane %v3162_v16, %v387_v19 }
 0x7a7   :  { %v1409_v7 = vadd.f32 1.0, %v2648_v6 }
 0x7a8   :  { %1418 = vrot.lane.b32.xlu0 %v1416_v3, %s2882_s6 }
 0x7a9   :  { %2649 = vrcp.f32 %v1409_v7  ;;  %v424_v7 = vrot.slane %v3162_v16, %v391_v29 }
 0x7b3   :  { %v2650_v59 = vpop.eup %2649 }
 0x81a   :  { %v1419_v10 = vpop.permute.xlu0 %1418 }
 0x81b   :  { %v1421_v56 = vadd.f32 %v1419_v10, %v1415_v8 }
 0x81d   :  { %2651 = vtanh.f32 %v1421_v56 }
 0x827   :  { %v2652_v11 = vpop.eup %2651 }
 0x828   :  { %v1423_v12 = vmul.f32 %v2652_v11, %v2650_v59 }
 0x82a   :  { %1425 = vrot.lane.b32.xlu1 %v1423_v12, %s2882_s6 }
 0x89c   :  { %v1426_v13 = vpop.permute.xlu1 %1425 }
 0x89d   :  { %2041 = vmatmul.mubr.msk.f32.vlgmr.msra.gmra.mrb[4].mxu0 %vm1033_vm0, %v1426_v13 }
 0x89e   :  { %2492 = vmatpush1.bf16.msra.mxu0 %v3020_v14  ;;  %1689 = vmatprep.mubr.f32.mxu0 %v2881_v0 }
 0x89f   :  { %2494 = vmatprep.subr.bf16.mxu0 %v3023_v15 }
 0x8a2   :  { %2496 = vmatpush1.bf16.msra.mxu0 %v3027_v20 }
 0x8a3   :  { %2498 = vmatprep.subr.bf16.mxu0 %v3031_v21 }
 0x8a6   :  { %2500 = vmatpush1.bf16.msra.mxu0 %v3034_v26 }
 0x8a7   :  { %2502 = vmatprep.subr.bf16.mxu0 %v3037_v27 }
 0x8aa   :  { %2504 = vmatpush1.bf16.msra.mxu0 %v3040_v30 }
 0x970   :  { %v1495_v18 = vpop.f32.mrb[4].mxu0 }
 0x971   :  { %v2565_v22 = vadd.f32 %v1495_v18, %v404_v17  ;;  %v1497_v23 = vpop.f32.mrb[5].mxu0 }
 0x972   :  { %v2566_v28 = vadd.f32 %v1497_v23, %v408_v25 }
 0x973   :  { %v2042_v24 = vmul.f32 -1.442695, %v2565_v22 }
 0x974   :  { %v2043_v58 = vmul.f32 -1.442695, %v2566_v28 }
 0x975   :  { %2653 = vpow2.f32 %v2042_v24 }
 0x976   :  { %2655 = vtanh.f32 %v2566_v28 }
 0x97f   :  { %v2654_v31 = vpop.eup %2653 }
 0x980   :  { %v1506_v32 = vadd.f32 1.0, %v2654_v31  ;;  %v2656_v33 = vpop.eup %2655  ;;  %v428_v31 = vrot.slane %v3162_v16, %v395_v48  ;;  %v1819_v48 = vld [vmem:[#allocation10] sm:$0xff] }
 0x982   :  { %2657 = vrcp.f32 %v1506_v32 }
 0x983   :  { %2659 = vpow2.f32 %v2043_v58  ;;  %v432_v58 = vrot.slane %v3162_v16, %v399_v54 }
 0x98c   :  { %v2658_v34 = vpop.eup %2657 }
 0x98d   :  { %v1514_v35 = vmul.f32 %v2658_v34, %v2656_v33  ;;  %v2660_v36 = vpop.eup %2659  ;;  %v1513_v38 = vmul.f32 %v2658_v34, %v1421_v56 }
 0x98e   :  { %v1507_v37 = vadd.f32 1.0, %v2660_v36 }
 0x98f   :  { %1516 = vrot.lane.b32.xlu0 %v1514_v35, %s2882_s6 }
 0x990   :  { %2661 = vrcp.f32 %v1507_v37 }
 0x99a   :  { %v2662_v2 = vpop.eup %2661 }
 0xa01   :  { %v1517_v40 = vpop.permute.xlu0 %1516 }
 0xa02   :  { %v1519_v41 = vadd.f32 %v1517_v40, %v1513_v38 }
 0xa04   :  { %2663 = vtanh.f32 %v1519_v41 }
 0xa0e   :  { %v2664_v42 = vpop.eup %2663 }
 0xa0f   :  { %v1521_v43 = vmul.f32 %v2664_v42, %v2662_v2  ;;  %v1820_v42 = vld [vmem:[#allocation10 + $0x8] sm:$0xff] }
 0xa11   :  { %1523 = vrot.lane.b32.xlu1 %v1521_v43, %s2882_s6  ;;  %v1821_v43 = vld [vmem:[#allocation10 + $0x10] sm:$0xff] }
 0xa12   :  { %v2525_v54 = vpack.c.bf16 %v1822_v57, %v1821_v43 }
 0xa83   :  { %v1524_v4 = vpop.permute.xlu1 %1523 }
 0xa84   :  { %2044 = vmatmul.mubr.msk.f32.vlgmr.msra.gmra.mrb[4].mxu1 %vm1033_vm0, %v1524_v4  ;;  %v2883_v4 = vmov 0.0|0.0  }
 0xa85   :  { %2508 = vmatpush1.bf16.msra.mxu1 %v3020_v14  ;;  %1787 = vmatprep.mubr.f32.mxu1 %v2881_v0 }
 0xa86   :  { %2510 = vmatprep.subr.bf16.mxu1 %v3023_v15  ;;  %v416_v15 = vrot.slane %v3162_v16, %v383_v60  ;;  %2521 = vmatprep.subr.bf16.mxu0 %v2883_v4  ;;  %v1823_v16 = vld [vmem:[#allocation10 + $0x20] sm:$0xff] }
 0xa89   :  { %2512 = vmatpush1.bf16.msra.mxu1 %v3027_v20 }
 0xa8a   :  { %2514 = vmatprep.subr.bf16.mxu1 %v3031_v21 }
 0xa8d   :  { %2516 = vmatpush1.bf16.msra.mxu1 %v3034_v26 }
 0xa8e   :  { %2518 = vmatprep.subr.bf16.mxu1 %v3037_v27 }
 0xa91   :  { %2520 = vmatpush1.bf16.msra.mxu1 %v3040_v30 }
 0xa92   :  { %2533 = vmatprep.subr.bf16.mxu1 %v2883_v4 }
 0xb57   :  { %v1593_v45 = vpop.f32.mrb[4].mxu1 }
 0xb58   :  { %v2567_v14 = vadd.f32 %v1593_v45, %v412_v44  ;;  %v1595_v46 = vpop.f32.mrb[5].mxu1  ;;  %v2522_v44 = vpack.c.bf16 %v1820_v42, %v1819_v48  ;;  %v1824_v45 = vld [vmem:[#allocation10 + $0x28] sm:$0xff] }
 0xb59   :  { %v2568_v20 = vadd.f32 %v1595_v46, %v416_v15  ;;  %v1825_v46 = vld [vmem:[#allocation10 + $0x30] sm:$0xff] }
 0xb5a   :  { %v2045_v47 = vmul.f32 -1.442695, %v2567_v14  ;;  %v2528_v14 = vpack.c.bf16 %v1824_v45, %v1823_v16 }
 0xb5b   :  { %v2046_v39 = vmul.f32 -1.442695, %v2568_v20 }
 0xb5c   :  { %2665 = vpow2.f32 %v2045_v47  ;;  %v1826_v47 = vld [vmem:[#allocation10 + $0x38] sm:$0xff] }
 0xb5d   :  { %2667 = vtanh.f32 %v2568_v20  ;;  %v2531_v15 = vpack.c.bf16 %v1826_v47, %v1825_v46 }
 0xb66   :  { %v2666_v21 = vpop.eup %2665 }
 0xb67   :  { %v1604_v26 = vadd.f32 1.0, %v2666_v21  ;;  %v2668_v27 = vpop.eup %2667 }
 0xb69   :  { %2669 = vrcp.f32 %v1604_v26 }
 0xb6a   :  { %2671 = vpow2.f32 %v2046_v39  ;;  %v1913_v39 = vld [vmem:[#allocation11 + $0x8] sm:$0xff] }
 0xb73   :  { %v2670_v30 = vpop.eup %2669 }
 0xb74   :  { %v1612_v49 = vmul.f32 %v2670_v30, %v2668_v27  ;;  %v2672_v50 = vpop.eup %2671  ;;  %v1611_v52 = vmul.f32 %v2670_v30, %v1519_v41 }
 0xb75   :  { %v1605_v51 = vadd.f32 1.0, %v2672_v50  ;;  %v1914_v50 = vld [vmem:[#allocation11 + $0x10] sm:$0xff] }
 0xb76   :  { %1614 = vrot.lane.b32.xlu0 %v1612_v49, %s2882_s6  ;;  %v1912_v49 = vld [vmem:[#allocation11] sm:$0xff] }
 0xb77   :  { %2673 = vrcp.f32 %v1605_v51  ;;  %v2534_v51 = vpack.c.bf16 %v1913_v39, %v1912_v49 }
 0xb81   :  { %v2674_v60 = vpop.eup %2673 }
 0xbe8   :  { %v1615_v53 = vpop.permute.xlu0 %1614 }
 0xbe9   :  { %v1617_v55 = vadd.f32 %v1615_v53, %v1611_v52  ;;  %v1915_v52 = vld [vmem:[#allocation11 + $0x18] sm:$0xff] }
 0xbea   :  { %v2537_v53 = vpack.c.bf16 %v1915_v52, %v1914_v50 }
 0xbeb   :  { %2675 = vtanh.f32 %v1617_v55 }
 0xbf5   :  { %v2676_v61 = vpop.eup %2675 }
 0xbf6   :  { %v1619_v62 = vmul.f32 %v2676_v61, %v2674_v60  ;;  %v1917_v60 = vld [vmem:[#allocation11 + $0x28] sm:$0xff] }
 0xbf8   :  { %1621 = vrot.lane.b32.xlu1 %v1619_v62, %s2882_s6 }
 0xc6a   :  { %v1622_v9 = vpop.permute.xlu1 %1621 }
 0xc6b   :  { %2047 = vmatmul.mubr.msk.f32.vlgmr.msra.gmra.mrb[6].mxu0 %vm1033_vm0, %v1622_v9 }
 0xc6c   :  { %2099 = vmatprep.mubr.msk.f32.mxu0 %vm2884_vm1, %v2881_v0  ;;  %2523 = vmatpush3.bf16.msra.mxu0 %v2522_v44 }
 0xc6d   :  { %2524 = vmatprep.subr.bf16.mxu0 %v2883_v4 }
 0xc70   :  { %2526 = vmatpush3.bf16.msra.mxu0 %v2525_v54 }
 0xc71   :  { %2527 = vmatprep.subr.bf16.mxu0 %v2883_v4 }
 0xc74   :  { %2529 = vmatpush3.bf16.msra.mxu0 %v2528_v14 }
 0xc75   :  { %2530 = vmatprep.subr.bf16.mxu0 %v2883_v4 }
 0xc78   :  { %2532 = vmatpush3.bf16.msra.mxu0 %v2531_v15 }
 0xd3e   :  { %v1691_v1 = vpop.f32.mrb[6].mxu0 }
 0xd3f   :  { %v2569_v3 = vadd.f32 %v1691_v1, %v420_v63  ;;  %v1693_v5 = vpop.f32.mrb[7].mxu0  ;;  %v1918_v1 = vld [vmem:[#allocation11 + $0x30] sm:$0xff] }
 0xd40   :  { %v2570_v8 = vadd.f32 %v1693_v5, %v424_v7 }
 0xd41   :  { %v2048_v6 = vmul.f32 -1.442695, %v2569_v3  ;;  %v1919_v3 = vld [vmem:[#allocation11 + $0x38] sm:$0xff] }
 0xd42   :  { %v2049_v19 = vmul.f32 -1.442695, %v2570_v8 }
 0xd43   :  { %2677 = vpow2.f32 %v2048_v6  ;;  %v2543_v6 = vpack.c.bf16 %v1919_v3, %v1918_v1 }
 0xd44   :  { %2679 = vtanh.f32 %v2570_v8  ;;  %v1920_v8 = vld [vmem:[#allocation11 + $0x40] sm:$0xff] }
 0xd4d   :  { %v2678_v10 = vpop.eup %2677 }
 0xd4e   :  { %v1702_v56 = vadd.f32 1.0, %v2678_v10  ;;  %v2680_v59 = vpop.eup %2679  ;;  %v1921_v10 = vld [vmem:[#allocation11 + $0x48] sm:$0xff] }
 0xd50   :  { %2681 = vrcp.f32 %v1702_v56  ;;  %v2546_v56 = vpack.c.bf16 %v1921_v10, %v1920_v8 }
 0xd51   :  { %2683 = vpow2.f32 %v2049_v19  ;;  %v1924_v19 = vld [vmem:[#allocation11 + $0x60] sm:$0xff] }
 0xd5a   :  { %v2682_v11 = vpop.eup %2681 }
 0xd5b   :  { %v1710_v12 = vmul.f32 %v2682_v11, %v2680_v59  ;;  %v2684_v13 = vpop.eup %2683  ;;  %v1709_v18 = vmul.f32 %v2682_v11, %v1617_v55  ;;  %v1916_v55 = vld [vmem:[#allocation11 + $0x20] sm:$0xff]  ;;  %v1922_v59 = vld [vmem:[#allocation11 + $0x50] sm:$0xff]  ;;  %v1923_v11 = vld [vmem:[#allocation11 + $0x58] sm:$0xff] }
 0xd5c   :  { %v1703_v17 = vadd.f32 1.0, %v2684_v13  ;;  %v2540_v9 = vpack.c.bf16 %v1917_v60, %v1916_v55  ;;  %v1925_v13 = vld [vmem:[#allocation11 + $0x68] sm:$0xff] }
 0xd5d   :  { %1712 = vrot.lane.b32.xlu0 %v1710_v12, %s2882_s6  ;;  %v2549_v12 = vpack.c.bf16 %v1923_v11, %v1922_v59 }
 0xd5e   :  { %2685 = vrcp.f32 %v1703_v17  ;;  %v2552_v17 = vpack.c.bf16 %v1925_v13, %v1924_v19 }
 0xd68   :  { %v2686_v29 = vpop.eup %2685 }
 0xdcf   :  { %v1713_v22 = vpop.permute.xlu0 %1712 }
 0xdd0   :  { %v1715_v23 = vadd.f32 %v1713_v22, %v1709_v18  ;;  %v1926_v22 = vld [vmem:[#allocation11 + $0x70] sm:$0xff] }
 0xdd2   :  { %2687 = vtanh.f32 %v1715_v23 }
 0xddc   :  { %v2688_v24 = vpop.eup %2687 }
 0xddd   :  { %v1717_v25 = vmul.f32 %v2688_v24, %v2686_v29  ;;  %v2053_v24 = vld [vmem:[%s3245_s5] ss:$0 sm:$0xff]  ;;  %s2885_s5 = smov [#allocation13]  }
 0xdde   :  { %s2018_s12 = sshll.u32 %s2885_s5, 4  ;;  %s2019_s12 = int_to_ptr.vmem [resolvable:$true] %s2018_s12 }
 0xddf   :  { %1719 = vrot.lane.b32.xlu1 %v1717_v25, %s2882_s6  ;;  %s2838_s14 = scalar_lea.vmem %s2019_s12, 128  ;;  %p2843_p7 = scmp.lt.s32.totalorder %s2019_s12, %s2019_s12 }
 0xde0   :  { %p2839_p6 = scmp.ne.s32.totalorder %s2019_s12, %s2838_s14  ;;  %p2844_p8 = scmp.lt.s32.totalorder %s2838_s14, %s2838_s14 }
 0xde2   :  { %p2845_p9 = por %p2844_p8, %p2843_p7 }
 0xde4   :  { %p2846_p10 = pnand %p2845_p9, %p2839_p6 }
 0xe51   :  { %v1720_v28 = vpop.permute.xlu1 %1719 }
 0xe52   :  { %2050 = vmatmul.mubr.msk.f32.vlgmr.msra.gmra.mrb[6].mxu1 %vm1033_vm0, %v1720_v28 }
 0xe53   :  { %2134 = vmatprep.mubr.msk.f32.mxu1 %vm2884_vm1, %v2881_v0  ;;  %2535 = vmatpush3.bf16.msra.mxu1 %v2534_v51 }
 0xe54   :  { %2536 = vmatprep.subr.bf16.mxu1 %v2883_v4 }
 0xe57   :  { %2538 = vmatpush3.bf16.msra.mxu1 %v2537_v53 }
 0xe58   :  { %2539 = vmatprep.subr.bf16.mxu1 %v2883_v4 }
 0xe5b   :  { %2541 = vmatpush3.bf16.msra.mxu1 %v2540_v9 }
 0xe5c   :  { %2542 = vmatprep.subr.bf16.mxu1 %v2883_v4 }
 0xe5f   :  { %2544 = vmatpush3.bf16.msra.mxu1 %v2543_v6 }
 0xe60   :  { %2545 = vmatprep.subr.bf16.mxu1 %v2883_v4 }
 0xe63   :  { %2547 = vmatpush3.bf16.msra.mxu1 %v2546_v56 }
 0xe64   :  { %2548 = vmatprep.subr.bf16.mxu1 %v2883_v4 }
 0xe67   :  { %2550 = vmatpush3.bf16.msra.mxu1 %v2549_v12 }
 0xe68   :  { %2551 = vmatprep.subr.bf16.mxu1 %v2883_v4 }
 0xe6b   :  { %2553 = vmatpush3.bf16.msra.mxu1 %v2552_v17 }
 0xe6c   :  { %2554 = vmatprep.subr.bf16.mxu1 %v2883_v4 }
 0xf25   :  { %v1789_v32 = vpop.f32.mrb[6].mxu1 }
 0xf26   :  { %v2571_v33 = vadd.f32 %v1789_v32, %v428_v31  ;;  %v1791_v34 = vpop.f32.mrb[7].mxu1 }
 0xf27   :  { %v2572_v36 = vadd.f32 %v1791_v34, %v432_v58  ;;  %v2055_v34 = vld [vmem:[%s3247_s7] ss:$0 sm:$0xff] }
 0xf28   :  { %v2051_v35 = vmul.f32 -1.442695, %v2571_v33 }
 0xf29   :  { %v2052_v20 = vmul.f32 -1.442695, %v2572_v36 }
 0xf2a   :  { %2689 = vpow2.f32 %v2051_v35 }
 0xf2b   :  { %2691 = vtanh.f32 %v2572_v36 }
 0xf34   :  { %v2690_v37 = vpop.eup %2689 }
 0xf35   :  { %v1800_v38 = vadd.f32 1.0, %v2690_v37  ;;  %v2692_v40 = vpop.eup %2691 }
 0xf37   :  { %2693 = vrcp.f32 %v1800_v38 }
 0xf38   :  { %2695 = vpow2.f32 %v2052_v20 }
 0xf41   :  { %v2694_v41 = vpop.eup %2693 }
 0xf42   :  { %v1808_v2 = vmul.f32 %v2694_v41, %v2692_v40  ;;  %v2696_v0 = vpop.eup %2695  ;;  %v1807_v26 = vmul.f32 %v2694_v41, %v1715_v23  ;;  %v1927_v23 = vld [vmem:[#allocation11 + $0x78] sm:$0xff] }
 0xf43   :  { %v1801_v21 = vadd.f32 1.0, %v2696_v0  ;;  %v2555_v29 = vpack.c.bf16 %v1927_v23, %v1926_v22 }
 0xf44   :  { %1810 = vrot.lane.b32.xlu0 %v1808_v2, %s2882_s6 }
 0xf45   :  { %2697 = vrcp.f32 %v1801_v21  ;;  %2556 = vmatpush3.bf16.msra.mxu1 %v2555_v29 }
 0xf4f   :  { %v2698_v61 = vpop.eup %2697 }
 0xfb6   :  { %v1811_v27 = vpop.permute.xlu0 %1810 }
 0xfb7   :  { %v1813_v30 = vadd.f32 %v1811_v27, %v1807_v26 }
 0xfb9   :  { %2699 = vtanh.f32 %v1813_v30 }
 0xfc3   :  { %v2700_v62 = vpop.eup %2699 }
 0xfc4   :  { %v1815_v63 = vmul.f32 %v2700_v62, %v2698_v61 }
 0xfc6   :  { %vm1816_vm2 = vcmp.ge.f32.partialorder %v1815_v63, 0.0  ;;  %v1817_v5 = vmul.f32 0.3, %v1815_v63 }
 0xfc8   :  { %v1818_v7 = vsel %vm1816_vm2, %v1815_v63, %v1817_v5 }
 0xfc9   :  { %1835 = vrot.lane.b32.xlu1 %v1818_v7, %s2882_s6 }
0x103b   :  { %v1836_v18 = vpop.permute.xlu1 %1835 }
0x103c   :  { %2100 = vmatmul.mubr.msk.f32.vlgmr.msra.gmra.mrb[8].mxu0 %vm1033_vm0, %v1836_v18 }
0x110f   :  { %v1905_v25 = vpop.f32.mrb[8].mxu0 }
0x1110   :  { %v1906_v28 = vadd.f32 %v2053_v24, %v1905_v25  ;;  %v2101_v31 = vpop.f32.mrb[9].mxu0 }
0x1112   :  { %vm1909_vm3 = vcmp.ge.f32.partialorder %v1906_v28, 0.0  ;;  %v1910_v32 = vmul.f32 0.3, %v1906_v28 }
0x1114   :  { %v1911_v33 = vsel %vm1909_vm3, %v1906_v28, %v1910_v32 }
0x1115   :  { %2135 = vmatmul.mubr.f32.vlgmr.msra.gmra.mrb[8].mxu1 %v1911_v33 }
0x11e8   :  { %v2001_v35 = vpop.f32.mrb[8].mxu1 }
0x11e9   :  { %v2002_v58 = vadd.f32 %v2055_v34, %v2001_v35  ;;  %v2136_v36 = vpop.f32.mrb[9].mxu1 }
0x11eb   :  { %v2056_v37 = vmul.f32 -1.442695, %v2002_v58 }
0x11ed   :  { %2701 = vpow2.f32 %v2056_v37 }
0x11f7   :  { %v2702_v38 = vpop.eup %2701 }
0x11f8   :  { %v2008_v40 = vadd.f32 1.0, %v2702_v38 }
0x11fa   :  { %2703 = vrcp.f32 %v2008_v40 }
0x1204   :  { %v2704_v41 = vpop.eup %2703 }
0x1205   :  { %2011 = vst [vmem:[#allocation13] sm:$0xff] %v2704_v41 }
0x1206   :  { %2849 = shalt.err (!%p2846_p10)
}
0x1207   :  { %s2850_s17 = scalar_lea.hbm %s3248_s8, 128 }
0x1208   :  { %p2851_p11 = scmp.ne.s32.totalorder %s3248_s8, %s2850_s17  ;;  %p2854_p12 = scmp.lt.u32.totalorder %s2850_s17, %s3248_s8 }
0x120a   :  { %p2856_p13 = pnand %p2854_p12, %p2851_p11 }
0x120c   :  { %2859 = shalt.err (!%p2856_p13)
}
0x120d   :  { %2021 = dma.vmem_to_hbm [thread:$0]  %s2019_s12, 128, %s3248_s8, [#allocation4]  }
0x120e   :  { %2868 = dma.done.wait [#allocation4], 128  }
0x120f   :  { %2869 = vsyncadd [#allocation4], 4294967168 }
0x1210   :  { %2025 = vsyncpa [#allocation3], 1 }
0x1211   :  { %2026 = vsyncpa [#allocation6], 1 }
0x1212   :  { %2027 = vsyncpa [#allocation9], 1 }
0x1213   :  { %2028 = vsyncpa [#allocation12], 1 }
0x1214   :  { %2029 = vsyncpa [#allocation4], 1 }

</bundles_post_ra>
